<compile_context>
chip_gen: v5e
topology: v5e:2x2
jax: 0.10.0
libtpu: 0.0.40
codegen_flags: <defaults>
</compile_context>

<pallas_src>
import functools

import jax
import jax.numpy as jnp
from jax.experimental import pallas as pl
from jax.experimental.pallas import tpu as pltpu


def _round_up(x, m):
    return (x + m - 1) // m * m


# -----------------------------------------------------------------------------
# Pallas kernel: (k == 0) Linear -> ReLU -> Linear ; (k >= 1) APPNP step ;
#                (k == K) log_softmax over the real class lanes, single write.
# -----------------------------------------------------------------------------
def appnp_net_kernel(x_ref, w1_ref, b1_ref, w2_ref, b2_ref, a_ref, o_ref,
                     z0_ref, z_ref, *, K, alpha, tm, n_pad, n_classes,
                     a_resident):
    k = pl.program_id(0)          # 0 = MLP phase, 1..K = propagation steps
    i = pl.program_id(1)          # row tile index
    row0 = pl.multiple_of(i * tm, tm)

    @pl.when(k == 0)
    def _mlp():
        # lin1 + ReLU (dropout is identity in eval mode), then lin2.
        h = jnp.dot(x_ref[...], w1_ref[...],
                    preferred_element_type=jnp.float32) + b1_ref[...]
        h = jnp.maximum(h, 0.0)
        z0 = jnp.dot(h.astype(w2_ref.dtype), w2_ref[...],
                     preferred_element_type=jnp.float32) + b2_ref[...]
        z0_ref[pl.ds(row0, tm), :] = z0
        # Ping-pong slot 0 <- bf16 cast of z0 (matches reference's step-1 cast).
        z_ref[pl.ds(row0, tm), :] = z0.astype(z_ref.dtype)

    @pl.when(k > 0)
    def _prop():
        # Ping-pong slots inside the flat (2*n_pad, c_pad) bf16 scratch.
        src_off = pl.multiple_of(((k + 1) % 2) * n_pad, tm)
        dst_off = pl.multiple_of((k % 2) * n_pad + row0, tm)
        z_old = z_ref[pl.ds(src_off, n_pad), :]          # bf16, no recast
        if a_resident:
            a_tile = a_ref[pl.ds(row0, tm), :]           # slice resident A_hat
        else:
            a_tile = a_ref[...]                          # streamed row tile
        az = jnp.dot(a_tile, z_old, preferred_element_type=jnp.float32)
        z_new = (1.0 - alpha) * az + alpha * z0_ref[pl.ds(row0, tm), :]

        @pl.when(k < K)
        def _():
            z_ref[pl.ds(dst_off, tm), :] = z_new.astype(z_ref.dtype)

        @pl.when(k == K)
        def _():
            # log_softmax over the real class lanes only (padded lanes masked).
            col = jax.lax.broadcasted_iota(jnp.int32, z_new.shape, 1)
            valid = col < n_classes
            zm = jnp.where(valid, z_new, -jnp.inf)
            m = jnp.max(zm, axis=-1, keepdims=True)
            s = zm - m
            p = jnp.where(valid, jnp.exp(s), 0.0)
            lse = jnp.log(jnp.sum(p, axis=-1, keepdims=True))
            # Single write into the resident output block.
            o_ref[pl.ds(row0, tm), :] = s - lse


def _estimate_vmem_bytes(n_pad, f_pad, h_pad, c_pad, tm, a_resident):
    """Conservative VMEM footprint estimate (double-buffered streamed inputs)."""
    bf, f32 = 2, 4
    scratch = n_pad * c_pad * f32 + 2 * n_pad * c_pad * bf      # z0 + z (bf16)
    out_blk = n_pad * c_pad * f32                                # resident out
    x_blk = 2 * tm * f_pad * bf
    w_blk = 2 * (f_pad * h_pad * bf + 8 * h_pad * f32
                 + h_pad * c_pad * bf + 8 * c_pad * f32)
    a_blk = n_pad * n_pad * bf if a_resident else 2 * tm * n_pad * bf
    return scratch + out_blk + x_blk + w_blk + a_blk


def appnp_net_forward(x, w1, b1, w2, b2, a_hat, *, K, alpha, tm=128):
    assert K >= 1, "APPNP propagation requires K >= 1"
    N, F = x.shape
    H = w1.shape[1]
    C = w2.shape[1]
    n_pad = _round_up(N, tm)
    f_pad = _round_up(F, 128)
    h_pad = _round_up(H, 128)
    c_pad = _round_up(C, 128)
    n_tiles = n_pad // tm

    bf16 = jnp.bfloat16
    xp = jnp.zeros((n_pad, f_pad), bf16).at[:N, :F].set(x.astype(bf16))
    w1p = jnp.zeros((f_pad, h_pad), bf16).at[:F, :H].set(w1.astype(bf16))
    b1p = jnp.zeros((1, h_pad), jnp.float32).at[:, :H].set(b1)
    w2p = jnp.zeros((h_pad, c_pad), bf16).at[:H, :C].set(w2.astype(bf16))
    b2p = jnp.zeros((1, c_pad), jnp.float32).at[:, :C].set(b2)
    ap = jnp.zeros((n_pad, n_pad), bf16).at[:N, :N].set(a_hat.astype(bf16))

    # --- VMEM budgeting: decide A_hat residency and the scoped-VMEM limit. ---
    try:
        phys_vmem = int(pltpu.get_tpu_info().vmem_capacity_bytes)
    except Exception:
        phys_vmem = 64 << 20          # safe fallback (v7x per-TC VMEM)
    budget = int(phys_vmem * 0.80)
    a_resident = _estimate_vmem_bytes(n_pad, f_pad, h_pad, c_pad, tm,
                                      a_resident=True) <= budget
    est = _estimate_vmem_bytes(n_pad, f_pad, h_pad, c_pad, tm, a_resident)
    vmem_limit = int(min(budget, max(32 << 20, int(est * 1.3))))

    kernel = functools.partial(
        appnp_net_kernel, K=K, alpha=float(alpha), tm=tm,
        n_pad=n_pad, n_classes=C, a_resident=a_resident)

    # x is only needed on the k == 0 phase; its index map collapses to block
    # (0, 0) during propagation so the pipeline does not re-stream it.
    if a_resident:
        # Full A_hat resident in VMEM for the whole grid (fetched once).
        a_spec = pl.BlockSpec((n_pad, n_pad), lambda k, i: (0, 0))
    else:
        # Streamed (tm, n_pad) row tiles; tile 0 (cheap) during the MLP phase.
        a_spec = pl.BlockSpec((tm, n_pad),
                              lambda k, i: (i * jnp.minimum(k, 1), 0))

    out = pl.pallas_call(
        kernel,
        out_shape=jax.ShapeDtypeStruct((n_pad, c_pad), jnp.float32),
        grid=(K + 1, n_tiles),
        in_specs=[
            pl.BlockSpec((tm, f_pad),
                         lambda k, i: (i * (1 - jnp.minimum(k, 1)), 0)),
            pl.BlockSpec((f_pad, h_pad), lambda k, i: (0, 0)),
            pl.BlockSpec((1, h_pad), lambda k, i: (0, 0)),
            pl.BlockSpec((h_pad, c_pad), lambda k, i: (0, 0)),
            pl.BlockSpec((1, c_pad), lambda k, i: (0, 0)),
            a_spec,
        ],
        # Resident output block: constant index map, written back to HBM once.
        out_specs=pl.BlockSpec((n_pad, c_pad), lambda k, i: (0, 0)),
        scratch_shapes=[
            pltpu.VMEM((n_pad, c_pad), jnp.float32),       # z0 (teleport term)
            pltpu.VMEM((2 * n_pad, c_pad), jnp.bfloat16),  # z ping-pong (bf16)
        ],
        # Both axes MUST stay "arbitrary": the K axis is sequentially dependent
        # and the row-tile axis shares the resident z/z0 scratch across tiles,
        # so neither may be split across TensorCores or reordered.
        compiler_params=pltpu.CompilerParams(
            dimension_semantics=("arbitrary", "arbitrary"),
            vmem_limit_bytes=vmem_limit),
    )(xp, w1p, b1p, w2p, b2p, ap)

    return out[:N, :C]


# -----------------------------------------------------------------------------
# Glue: deterministic parameter init (PyTorch Linear style) + gcn_norm adjacency
# -----------------------------------------------------------------------------
def torch_linear_init(key, fan_in, fan_out):
    """Matches torch.nn.Linear default init: U(-1/sqrt(fan_in), 1/sqrt(fan_in))."""
    kw, kb = jax.random.split(key)
    bound = 1.0 / jnp.sqrt(jnp.float32(fan_in))
    # Stored transposed: (fan_in, fan_out) so the kernel computes x @ W.
    w = jax.random.uniform(kw, (fan_in, fan_out), jnp.float32, -bound, bound)
    b = jax.random.uniform(kb, (1, fan_out), jnp.float32, -bound, bound)
    return w, b


def gcn_norm_dense(edge_index, num_nodes):
    """Dense D^{-1/2} (A + I) D^{-1/2} from a (2, E) edge_index."""
    src, dst = edge_index[0], edge_index[1]
    a = jnp.zeros((num_nodes, num_nodes), jnp.float32)
    a = a.at[src, dst].add(1.0)   # duplicate edges sum, matching PyG scatter-add
    a = a + jnp.eye(num_nodes, dtype=jnp.float32)      # add self-loops
    deg = jnp.sum(a, axis=1)
    dinv = jnp.where(deg > 0, 1.0 / jnp.sqrt(deg), 0.0)
    return a * dinv[:, None] * dinv[None, :]


def reference_mixed(x, w1, b1, w2, b2, a_hat, *, K, alpha):
    """Pure-JAX reference using the same bf16-input / f32-accumulate recipe."""
    bf16 = jnp.bfloat16
    h = jnp.dot(x.astype(bf16), w1.astype(bf16),
                preferred_element_type=jnp.float32) + b1
    h = jnp.maximum(h, 0.0)
    z0 = jnp.dot(h.astype(bf16), w2.astype(bf16),
                 preferred_element_type=jnp.float32) + b2
    ab = a_hat.astype(bf16)
    z = z0
    for _ in range(K):
        z = (1.0 - alpha) * jnp.dot(ab, z.astype(bf16),
                                    preferred_element_type=jnp.float32) \
            + alpha * z0
    return jax.nn.log_softmax(z, axis=1)


if __name__ == "__main__":
    # Small synthetic "dataset": 200 nodes, 32 features, 64 hidden, 8 classes.
    N, F, H, C = 200, 32, 64, 8
    K, alpha = 10, 0.1

    key = jax.random.PRNGKey(0)
    kx, ke1, ke2, k1, k2 = jax.random.split(key, 5)

    x = jax.random.normal(kx, (N, F), jnp.float32)

    # Random undirected graph: sample directed edges, add reverse direction.
    num_edges = 800
    src = jax.random.randint(ke1, (num_edges,), 0, N)
    dst = jax.random.randint(ke2, (num_edges,), 0, N)
    edge_index = jnp.stack(
        [jnp.concatenate([src, dst]), jnp.concatenate([dst, src])], axis=0)

    w1, b1 = torch_linear_init(k1, F, H)
    w2, b2 = torch_linear_init(k2, H, C)

    a_hat = gcn_norm_dense(edge_index, N)

    out = appnp_net_forward(x, w1, b1, w2, b2, a_hat, K=K, alpha=alpha)
    out = jax.block_until_ready(out)

    ref = reference_mixed(x, w1, b1, w2, b2, a_hat, K=K, alpha=alpha)
    assert out.shape == (N, C)
    assert bool(jnp.all(jnp.isfinite(out)))
    assert jnp.allclose(out, ref, atol=2e-3, rtol=2e-3)

    print("KERNEL_OK")
</pallas_src>

<mosaic_0001>
module attributes {stable_mosaic.version = 11 : i64} {
  func.func @appnp_net_kernel(%arg0: i32, %arg1: i32, %arg2: memref<128x128xbf16, #tpu.memory_space<vmem>>, %arg3: memref<128x128xbf16, #tpu.memory_space<vmem>>, %arg4: memref<1x128xf32, #tpu.memory_space<vmem>>, %arg5: memref<128x128xbf16, #tpu.memory_space<vmem>>, %arg6: memref<1x128xf32, #tpu.memory_space<vmem>>, %arg7: memref<256x256xbf16, #tpu.memory_space<vmem>>, %arg8: memref<256x128xf32, #tpu.memory_space<vmem>>, %arg9: memref<256x128xf32, #tpu.memory_space<vmem>>, %arg10: memref<512x128xbf16, #tpu.memory_space<vmem>>) attributes {dimension_semantics = [#tpu.dimension_semantics<arbitrary>, #tpu.dimension_semantics<arbitrary>], iteration_bounds = array<i64: 11, 2>, scalar_prefetch = 0 : i64, scratch_operands = 2 : i64, tpu.core_type = #tpu.core_type<tc>, window_params = [{transform_indices = @transform_0, window_bounds = array<i64: 128, 128>}, {pipeline_mode = #tpu.pipeline_mode<synchronous>, transform_indices = @transform_1, window_bounds = array<i64: 128, 128>}, {pipeline_mode = #tpu.pipeline_mode<synchronous>, transform_indices = @transform_2, window_bounds = array<i64: 1, 128>}, {pipeline_mode = #tpu.pipeline_mode<synchronous>, transform_indices = @transform_3, window_bounds = array<i64: 128, 128>}, {pipeline_mode = #tpu.pipeline_mode<synchronous>, transform_indices = @transform_4, window_bounds = array<i64: 1, 128>}, {pipeline_mode = #tpu.pipeline_mode<synchronous>, transform_indices = @transform_5, window_bounds = array<i64: 256, 256>}, {pipeline_mode = #tpu.pipeline_mode<synchronous>, transform_indices = @transform_6, window_bounds = array<i64: 256, 128>}]} {
    %c128_i32 = arith.constant 128 : i32
    %0 = arith.muli %arg1, %c128_i32 : i32
    %1 = tpu.assume_multiple %0, 128 : i32
    %c0_i32 = arith.constant 0 : i32
    %2 = arith.cmpi eq, %arg0, %c0_i32 : i32
    %3 = arith.extui %2 : i1 to i32
    %c0_i32_0 = arith.constant 0 : i32
    %4 = arith.cmpi ne, %3, %c0_i32_0 : i32
    scf.if %4 {
      %c0 = arith.constant 0 : index
      %c0_3 = arith.constant 0 : index
      %8 = vector.load %arg2[%c0, %c0_3] : memref<128x128xbf16, #tpu.memory_space<vmem>>, vector<128x128xbf16>
      %c0_4 = arith.constant 0 : index
      %c0_5 = arith.constant 0 : index
      %9 = vector.load %arg3[%c0_4, %c0_5] : memref<128x128xbf16, #tpu.memory_space<vmem>>, vector<128x128xbf16>
      %cst = arith.constant dense<0.000000e+00> : vector<128x128xf32>
      %10 = tpu.matmul %8, %9, %cst {dimension_numbers = #tpu.dot_dimension_numbers<[1], [0], [0], [1], [0, 0, 1, 1], [], []>} : vector<128x128xbf16>, vector<128x128xbf16>, vector<128x128xf32> -> vector<128x128xf32>
      %c0_6 = arith.constant 0 : index
      %c0_7 = arith.constant 0 : index
      %11 = vector.load %arg4[%c0_6, %c0_7] : memref<1x128xf32, #tpu.memory_space<vmem>>, vector<1x128xf32>
      %12 = vector.broadcast %11 : vector<1x128xf32> to vector<128x128xf32>
      %13 = arith.addf %10, %12 : vector<128x128xf32>
      %cst_8 = arith.constant 0.000000e+00 : f32
      %14 = vector.broadcast %cst_8 : f32 to vector<128x128xf32>
      %15 = arith.maximumf %13, %14 : vector<128x128xf32>
      %16 = arith.truncf %15 : vector<128x128xf32> to vector<128x128xbf16>
      %c0_9 = arith.constant 0 : index
      %c0_10 = arith.constant 0 : index
      %17 = vector.load %arg5[%c0_9, %c0_10] : memref<128x128xbf16, #tpu.memory_space<vmem>>, vector<128x128xbf16>
      %cst_11 = arith.constant dense<0.000000e+00> : vector<128x128xf32>
      %18 = tpu.matmul %16, %17, %cst_11 {dimension_numbers = #tpu.dot_dimension_numbers<[1], [0], [0], [1], [0, 0, 1, 1], [], []>} : vector<128x128xbf16>, vector<128x128xbf16>, vector<128x128xf32> -> vector<128x128xf32>
      %c0_12 = arith.constant 0 : index
      %c0_13 = arith.constant 0 : index
      %19 = vector.load %arg6[%c0_12, %c0_13] : memref<1x128xf32, #tpu.memory_space<vmem>>, vector<1x128xf32>
      %20 = vector.broadcast %19 : vector<1x128xf32> to vector<128x128xf32>
      %21 = arith.addf %18, %20 : vector<128x128xf32>
      %22 = arith.index_cast %1 : i32 to index
      %c0_14 = arith.constant 0 : index
      %23 = vector.load %arg9[%22, %c0_14] : memref<256x128xf32, #tpu.memory_space<vmem>>, vector<128x128xf32>
      tpu.vector_store %arg9[%22, %c0_14], %21 {strides = array<i32>} : memref<256x128xf32, #tpu.memory_space<vmem>>, vector<128x128xf32>,
      %24 = arith.truncf %21 : vector<128x128xf32> to vector<128x128xbf16>
      %25 = arith.index_cast %1 : i32 to index
      %c0_15 = arith.constant 0 : index
      %26 = vector.load %arg10[%25, %c0_15] : memref<512x128xbf16, #tpu.memory_space<vmem>>, vector<128x128xbf16>
      tpu.vector_store %arg10[%25, %c0_15], %24 {strides = array<i32>} : memref<512x128xbf16, #tpu.memory_space<vmem>>, vector<128x128xbf16>,
    } else {
    }
    %c0_i32_1 = arith.constant 0 : i32
    %5 = arith.cmpi sgt, %arg0, %c0_i32_1 : i32
    %6 = arith.extui %5 : i1 to i32
    %c0_i32_2 = arith.constant 0 : i32
    %7 = arith.cmpi ne, %6, %c0_i32_2 : i32
    scf.if %7 {
      %c1_i32 = arith.constant 1 : i32
      %8 = arith.addi %arg0, %c1_i32 : i32
      %c2_i32 = arith.constant 2 : i32
      %c0_i32_3 = arith.constant 0 : i32
      %9 = arith.cmpi eq, %c2_i32, %c0_i32_3 : i32
      %c1_i32_4 = arith.constant 1 : i32
      %10 = arith.select %9, %c1_i32_4, %c2_i32 : i32
      %11 = arith.remsi %8, %10 : i32
      %c0_i32_5 = arith.constant 0 : i32
      %12 = arith.cmpi ne, %11, %c0_i32_5 : i32
      %c0_i32_6 = arith.constant 0 : i32
      %13 = arith.cmpi slt, %11, %c0_i32_6 : i32
      %c0_i32_7 = arith.constant 0 : i32
      %14 = arith.cmpi slt, %10, %c0_i32_7 : i32
      %15 = arith.xori %13, %14 : i1
      %16 = arith.andi %15, %12 : i1
      %17 = arith.addi %11, %10 : i32
      %18 = arith.select %16, %17, %11 : i32
      %c256_i32 = arith.constant 256 : i32
      %19 = arith.muli %18, %c256_i32 : i32
      %20 = tpu.assume_multiple %19, 128 : i32
      %c2_i32_8 = arith.constant 2 : i32
      %c0_i32_9 = arith.constant 0 : i32
      %21 = arith.cmpi eq, %c2_i32_8, %c0_i32_9 : i32
      %c1_i32_10 = arith.constant 1 : i32
      %22 = arith.select %21, %c1_i32_10, %c2_i32_8 : i32
      %23 = arith.remsi %arg0, %22 : i32
      %c0_i32_11 = arith.constant 0 : i32
      %24 = arith.cmpi ne, %23, %c0_i32_11 : i32
      %c0_i32_12 = arith.constant 0 : i32
      %25 = arith.cmpi slt, %23, %c0_i32_12 : i32
      %c0_i32_13 = arith.constant 0 : i32
      %26 = arith.cmpi slt, %22, %c0_i32_13 : i32
      %27 = arith.xori %25, %26 : i1
      %28 = arith.andi %27, %24 : i1
      %29 = arith.addi %23, %22 : i32
      %30 = arith.select %28, %29, %23 : i32
      %c256_i32_14 = arith.constant 256 : i32
      %31 = arith.muli %30, %c256_i32_14 : i32
      %32 = arith.addi %31, %1 : i32
      %33 = tpu.assume_multiple %32, 128 : i32
      %34 = arith.index_cast %20 : i32 to index
      %c0 = arith.constant 0 : index
      %35 = vector.load %arg10[%34, %c0] : memref<512x128xbf16, #tpu.memory_space<vmem>>, vector<256x128xbf16>
      %36 = arith.index_cast %1 : i32 to index
      %c0_15 = arith.constant 0 : index
      %37 = vector.load %arg7[%36, %c0_15] : memref<256x256xbf16, #tpu.memory_space<vmem>>, vector<128x256xbf16>
      %cst = arith.constant dense<0.000000e+00> : vector<128x128xf32>
      %38 = tpu.matmul %37, %35, %cst {dimension_numbers = #tpu.dot_dimension_numbers<[1], [0], [0], [1], [0, 0, 1, 1], [], []>} : vector<128x256xbf16>, vector<256x128xbf16>, vector<128x128xf32> -> vector<128x128xf32>
      %cst_16 = arith.constant 0.899999976 : f32
      %39 = vector.broadcast %cst_16 : f32 to vector<128x128xf32>
      %40 = arith.mulf %39, %38 : vector<128x128xf32>
      %41 = arith.index_cast %1 : i32 to index
      %c0_17 = arith.constant 0 : index
      %42 = vector.load %arg9[%41, %c0_17] : memref<256x128xf32, #tpu.memory_space<vmem>>, vector<128x128xf32>
      %cst_18 = arith.constant 1.000000e-01 : f32
      %43 = vector.broadcast %cst_18 : f32 to vector<128x128xf32>
      %44 = arith.mulf %43, %42 : vector<128x128xf32>
      %45 = arith.addf %40, %44 : vector<128x128xf32>
      %c10_i32 = arith.constant 10 : i32
      %46 = arith.cmpi slt, %arg0, %c10_i32 : i32
      %47 = arith.extui %46 : i1 to i32
      %c0_i32_19 = arith.constant 0 : i32
      %48 = arith.cmpi ne, %47, %c0_i32_19 : i32
      scf.if %48 {
        %52 = arith.truncf %45 : vector<128x128xf32> to vector<128x128xbf16>
        %53 = arith.index_cast %33 : i32 to index
        %c0_22 = arith.constant 0 : index
        %54 = vector.load %arg10[%53, %c0_22] : memref<512x128xbf16, #tpu.memory_space<vmem>>, vector<128x128xbf16>
        tpu.vector_store %arg10[%53, %c0_22], %52 {strides = array<i32>} : memref<512x128xbf16, #tpu.memory_space<vmem>>, vector<128x128xbf16>,
      } else {
      }
      %c10_i32_20 = arith.constant 10 : i32
      %49 = arith.cmpi eq, %arg0, %c10_i32_20 : i32
      %50 = arith.extui %49 : i1 to i32
      %c0_i32_21 = arith.constant 0 : i32
      %51 = arith.cmpi ne, %50, %c0_i32_21 : i32
      scf.if %51 {
        %52 = tpu.iota {dimensions = array<i32: 1>} : vector<128x128xi32>
        %c8_i32 = arith.constant 8 : i32
        %53 = vector.broadcast %c8_i32 : i32 to vector<128x128xi32>
        %54 = arith.cmpi slt, %52, %53 : vector<128x128xi32>
        %cst_22 = arith.constant 0xFF800000 : f32
        %55 = vector.broadcast %cst_22 : f32 to vector<128x128xf32>
        %56 = arith.select %54, %45, %55 : vector<128x128xi1>, vector<128x128xf32>
        %cst_23 = arith.constant dense<0xFF800000> : vector<128xf32>
        %57 = vector.multi_reduction <maximumf>, %56, %cst_23 [1] : vector<128x128xf32> to vector<128xf32>
        %58 = vector.shape_cast %57 : vector<128xf32> to vector<128x1xf32>
        %59 = vector.broadcast %58 : vector<128x1xf32> to vector<128x128xf32>
        %60 = arith.subf %56, %59 : vector<128x128xf32>
        %61 = math.exp %60 : vector<128x128xf32>
        %cst_24 = arith.constant 0.000000e+00 : f32
        %62 = vector.broadcast %cst_24 : f32 to vector<128x128xf32>
        %63 = arith.select %54, %61, %62 : vector<128x128xi1>, vector<128x128xf32>
        %cst_25 = arith.constant dense<0.000000e+00> : vector<128xf32>
        %64 = vector.multi_reduction <add>, %63, %cst_25 [1] : vector<128x128xf32> to vector<128xf32>
        %65 = vector.shape_cast %64 : vector<128xf32> to vector<128x1xf32>
        %66 = math.log %65 : vector<128x1xf32>
        %67 = vector.broadcast %66 : vector<128x1xf32> to vector<128x128xf32>
        %68 = arith.subf %60, %67 : vector<128x128xf32>
        %69 = arith.index_cast %1 : i32 to index
        %c0_26 = arith.constant 0 : index
        %70 = vector.load %arg8[%69, %c0_26] : memref<256x128xf32, #tpu.memory_space<vmem>>, vector<128x128xf32>
        tpu.vector_store %arg8[%69, %c0_26], %68 {strides = array<i32>} : memref<256x128xf32, #tpu.memory_space<vmem>>, vector<128x128xf32>,
      } else {
      }
    } else {
    }
    return
  }
  func.func @transform_0(%arg0: i32, %arg1: i32) -> (i32, i32) {
    %c1_i32 = arith.constant 1 : i32
    %0 = arith.minsi %arg0, %c1_i32 : i32
    %c1_i32_0 = arith.constant 1 : i32
    %1 = arith.subi %c1_i32_0, %0 : i32
    %2 = arith.muli %arg1, %1 : i32
    %c0_i32 = arith.constant 0 : i32
    %c0_i32_1 = arith.constant 0 : i32
    return %2, %c0_i32 : i32, i32
  }
  func.func @transform_1(%arg0: i32, %arg1: i32) -> (i32, i32) {
    %c0_i32 = arith.constant 0 : i32
    %c0_i32_0 = arith.constant 0 : i32
    %c0_i32_1 = arith.constant 0 : i32
    return %c0_i32, %c0_i32_0 : i32, i32
  }
  func.func @transform_2(%arg0: i32, %arg1: i32) -> (i32, i32) {
    %c0_i32 = arith.constant 0 : i32
    %c0_i32_0 = arith.constant 0 : i32
    %c0_i32_1 = arith.constant 0 : i32
    return %c0_i32, %c0_i32_0 : i32, i32
  }
  func.func @transform_3(%arg0: i32, %arg1: i32) -> (i32, i32) {
    %c0_i32 = arith.constant 0 : i32
    %c0_i32_0 = arith.constant 0 : i32
    %c0_i32_1 = arith.constant 0 : i32
    return %c0_i32, %c0_i32_0 : i32, i32
  }
  func.func @transform_4(%arg0: i32, %arg1: i32) -> (i32, i32) {
    %c0_i32 = arith.constant 0 : i32
    %c0_i32_0 = arith.constant 0 : i32
    %c0_i32_1 = arith.constant 0 : i32
    return %c0_i32, %c0_i32_0 : i32, i32
  }
  func.func @transform_5(%arg0: i32, %arg1: i32) -> (i32, i32) {
    %c0_i32 = arith.constant 0 : i32
    %c0_i32_0 = arith.constant 0 : i32
    %c0_i32_1 = arith.constant 0 : i32
    return %c0_i32, %c0_i32_0 : i32, i32
  }
  func.func @transform_6(%arg0: i32, %arg1: i32) -> (i32, i32) {
    %c0_i32 = arith.constant 0 : i32
    %c0_i32_0 = arith.constant 0 : i32
    %c0_i32_1 = arith.constant 0 : i32
    return %c0_i32, %c0_i32_0 : i32, i32
  }
}

</mosaic_0001>

<bundles_post_ra>
// kernel: tpu_custom_call.1
= control target key start
LH: loop header
LB: loop body
LE: loop exit
PB: predicated region body
PF: predicated region fallthrough
CT: control target
= control target key end

     0   :  { %s2959_s0 = inlined_call_operand.hbm [shape: bf16[256,128], index: 0, kind: input, shape index: {}]   ;;  %s2960_s1 = inlined_call_operand.hbm [shape: bf16[128,128], index: 1, kind: input, shape index: {}]   ;;  %s2961_s2 = inlined_call_operand.vmem [shape: f32[1,128], index: 2, kind: input, shape index: {}]   ;;  %s2962_s3 = inlined_call_operand.hbm [shape: bf16[128,128], index: 3, kind: input, shape index: {}]   ;;  %s2963_s4 = inlined_call_operand.vmem [shape: f32[1,128], index: 4, kind: input, shape index: {}]   ;;  %s2964_s5 = inlined_call_operand.hbm [shape: bf16[256,256], index: 5, kind: input, shape index: {}]   ;;  %s2965_s6 = inlined_call_operand.hbm [shape: f32[256,128], index: 6, kind: output, shape index: {}]  }
   0x1   :  { %2973 = sst [smem:[#allocation21_spill]] %s2960_s1 }
   0x2   :  { %2974 = sst [smem:[#allocation22_spill]] %s2962_s3 }
   0x3   :  { %2975 = sst [smem:[#allocation23_spill]] %s2964_s5 }
   0x4   :  { %2976 = sst [smem:[#allocation24_spill]] %s2965_s6 }
   0x5   :  { %11 = vsyncpa [#allocation5], 0 }
   0x6   :  { %13 = vsyncpa [#allocation5 + $0x1], 0 }
   0x7   :  { %14 = vsyncpa [#allocation8], 0 }
   0x8   :  { %15 = vsyncpa [#allocation11], 0 }
   0x9   :  { %16 = vsyncpa [#allocation6], 0  ;;  %s2417_s21 = smov 0   ;;  %s2419_s22 = smov 0  }
   0xa   :  { %s2421_s23 = smov 0   ;;  %s2423_s24 = smov 0  }
   0xb   :  { %s2425_s25 = smov 0   ;;  %s2427_s26 = smov 0  }
   0xc   :  { %s2429_s27 = smov 0   ;;  %s2431_s28 = smov 0  }
   0xd LB: > { %2977 = sst [smem:[#allocation17_spill]] %s2362_s26  ;;  %s2966_s29 = sadd.s32 4294967295, %s2370_s28   ;;  %s2370_s28 = sphi %s2431_s28, %s22_s28   ;;  %s2366_s27 = sphi %s2429_s27, %s2997_s27   ;;  %s2362_s26 = sphi %s2427_s26, %s3001_s26   ;;  %s2358_s25 = sphi %s2425_s25, %s2996_s25   ;;  %s2354_s24 = sphi %s2423_s24, %s2995_s24   ;;  %s2350_s23 = sphi %s2421_s23, %s3000_s23   ;;  %s2346_s22 = sphi %s2419_s22, %s2999_s22   ;;  %s2342_s21 = sphi %s2417_s21, %s2998_s21  }
   0xe   : > { %2978 = sst [smem:[#allocation18_spill]] %s2366_s27  ;;  %p62_p0 = scmp.ne.s32.totalorder %s2346_s22, %s2342_s21 }
   0xf   : > { %2979 = sst [smem:[#allocation19_spill]] %s2370_s28  ;;  %p2459_p1 = scmp.eq.s32.totalorder %s2966_s29, 0 }
  0x10   : > { %p1520_p2 = scmp.ge.s32.totalorder %s2370_s28, 1  ;;  %p199_p3 = scmp.lt.s32.totalorder %s2370_s28, 23 }
  0x11   : > { %p2467_p4 = por %p2459_p1, %p62_p0  ;;  %s2982_s1 = sld [smem:[#allocation21_spill]] }
  0x12   : > { %p2474_p5 = pnand %p1520_p2, %p199_p3  ;;  %s2372_s12 = smov [#allocation7]  }
  0x13   : > { %s212_s13 = sshll.u32 %s2372_s12, 4  ;;  %s2985_s3 = sld [smem:[#allocation22_spill]]  ;;  %s213_s13 = int_to_ptr.vmem [resolvable:$true] %s212_s13 }
  0x14   : > { %p1981_p6 = pneg %p2474_p5  ;;  %s2967_s18 = smov 64  }
  0x15   : > { %s2968_s19 = smov 4   ;;  %s2375_s20 = smov [#allocation9]  }
  0x16   : > { %p2482_p7 = pnand %p1981_p6, %p2459_p1  ;;  %s229_s21 = sshll.u32 %s2375_s20, 4  ;;  %s230_s21 = int_to_ptr.vmem [resolvable:$true] %s229_s21 }
  0x17   : > { %s210_s10 = sshll.u32 %s2982_s1, 4  ;;  %s2986_s5 = sld [smem:[#allocation23_spill]]  ;;  %s211_s10 = int_to_ptr.hbm [resolvable:$true] %s210_s10 }
  0x18   : > { %1984 = dma.hbm_to_vmem [thread:$0]  (!%p2482_p7), %s211_s10, 1024, %s213_s13, [#allocation8], %s2967_s18, %s2967_s18, %s2968_s19  }
  0x19   : > { %s227_s17 = sshll.u32 %s2985_s3, 4  ;;  %s2376_s15 = smov [#allocation10]   ;;  %s228_s17 = int_to_ptr.hbm [resolvable:$true] %s227_s17 }
  0x1a   : > { %1987 = dma.hbm_to_vmem [thread:$0]  (!%p2482_p7), %s228_s17, 1024, %s230_s21, [#allocation8], %s2967_s18, %s2967_s18, %s2968_s19  }
  0x1b   : > { %s246_s10 = sshll.u32 %s2376_s15, 4  ;;  %s2377_s13 = smov 128   ;;  %s247_s10 = int_to_ptr.vmem [resolvable:$true] %s246_s10 }
  0x1c   : > { %s2378_s16 = smov 8   ;;  %s31_s20 = sadd.s32 1, %s2362_s26 }
  0x1d   : > { %s244_s12 = sshll.u32 %s2986_s5, 4  ;;  %p32_p8 = scmp.ge.s32.totalorder %s31_s20, 2  ;;  %s245_s12 = int_to_ptr.hbm [resolvable:$true] %s244_s12 }
  0x1e   : > { %1990 = dma.hbm_to_vmem [thread:$0]  (!%p2482_p7), %s245_s12, 4096, %s247_s10, [#allocation11], %s2377_s13, %s2377_s13, %s2378_s16  }
  0x1f   : > { %s34_s8 = sadd.s32 1, %s2366_s27  ;;  %p38_p9 = scmp.lt.s32.totalorder %s2366_s27, 1 }
  0x20   : > { %s3003_s20 = smov (%p32_p8, %s31_s20), 0  ;;  %s3005_s8 = smov (!%p32_p8, %s34_s8), %s2366_s27 }
  0x21   : > { %s39_s17 = scalar_select %p38_p9, %s2366_s27, 1 }
  0x22   : > { %p36_p10 = scmp.ge.s32.totalorder %s3005_s8, 11  ;;  %p56_p11 = scmp.ne.s32.totalorder %s2350_s23, %s2346_s22 }
  0x23   : > { %s40_s21 = ssub.s32 1, %s39_s17  ;;  %p57_p12 = scmp.eq.s32.totalorder %s2370_s28, 0 }
  0x24   : > { %s3007_s8 = smov (%p36_p10, %s3005_s8), 0  ;;  %s41_s14 = smul.u32 %s2362_s26, %s40_s21 }
  0x25   : > { %2987 = sst [smem:[#allocation20_spill]] %s3007_s8  ;;  %s49_s9 = sadd.s32 1, %s2350_s23 }
  0x26   : > { %p42_p13 = scmp.lt.s32.totalorder %s3007_s8, 1  ;;  %p2519_p0 = por %p57_p12, %p56_p11 }
  0x27   : > { %s260_s15 = sand.u32 1, %s2350_s23   ;;  %s1779_s10 = sshll.u32 %s41_s14, 6 }
  0x28   : > { %s43_s13 = scalar_select %p42_p13, %s3007_s8, 1 }
  0x29   : > { %p1998_p2 = scmp.lt.s32.totalorder %s2370_s28, 22  ;;  %s1525_s16 = sshll.u32 %s260_s15, 6 }
  0x2a   : > { %s44_s17 = ssub.s32 1, %s43_s13  ;;  %s273_s1 = scalar_lea.hbm %s2959_s0, %s1779_s10 }
  0x2b   : > { %s45_s29 = smul.u32 %s44_s17, %s3003_s20  ;;  %s274_s21 = sshll.u32 %s273_s1, 4  ;;  %s275_s21 = int_to_ptr.hbm [resolvable:$true] %s274_s21 }
  0x2c   : > { %s264_s3 = scalar_lea.vmem [#allocation4], %s1525_s16  ;;  %p1992_p6 = pnand %p1998_p2, %p2519_p0 }
  0x2d   : > { %s276_s5 = sshll.u32 %s264_s3, 4  ;;  %s46_s27 = ssub.s32 %s41_s14, %s45_s29  ;;  %s277_s5 = int_to_ptr.vmem [resolvable:$true] %s276_s5 }
  0x2e   : > { %p47_p3 = scmp.eq.s32.totalorder %s46_s27, 0  ;;  %s261_s8 = scalar_lea.sflag [#allocation5], %s260_s15 }
  0x2f   : > { %s2989_s6 = smov 4   ;;  %s2990_s28 = smov 64  }
  0x30   : > { %s2533_s26 = scalar_select %p47_p3, %s2350_s23, %s49_s9  }
  0x31   : > { %1994 = dma.hbm_to_vmem [thread:$0]  (!%p1992_p6), %s275_s21, 1024, %s277_s5, %s261_s8, %s2990_s28, %s2990_s28, %s2989_s6  }
  0x32   : > { %288 = sbr.rel (%p2474_p5) target bundleno = 1013 (0x3f5), region = 44  ;;  %s290_s1 = sand.u32 (!%p2474_p5), 1, %s2346_s22  }
  0x33   : > { %s1529_s3 = sshll.u32 (!%p2474_p5), %s290_s1, 6  ;;  %s291_s29 = scalar_lea.sflag (!%p2474_p5), [#allocation5], %s290_s1 }
  0x34   : > { %s2541_s27 = scalar_lea.vmem (!%p2474_p5), [#allocation4], %s1529_s3 }
  0x37   : > { %2325 = dma.done.wait (%p2467_p4), %s291_s29, 1024  }
  0x38   : > { %2327 = vsyncadd (%p2467_p4), %s291_s29, 4294966272 }
  0x39   : > { %2329 = dma.done.wait (%p2459_p1), [#allocation8], 2048  }
  0x3a   : > { %2331 = vsyncadd (%p2459_p1), [#allocation8], 4294965248 }
  0x3b   : > { %2333 = dma.done.wait (%p2459_p1), [#allocation11], 4096  }
  0x3c   : > { %2335 = vsyncadd (%p2459_p1), [#allocation11], 4294963200  ;;  %s2556_s5 = sshll.u32 %s2354_s24, 7  ;;  %p1534_p5 = scmp.ne.s32.totalorder %s2358_s25, 0 }
  0x3d   : > { %s2577_s7 = scalar_lea.vmem (!%p1534_p5), [#allocation2], %s2556_s5  ;;  %s699_s11 = sshra.s32 (!%p1534_p5), %s2556_s5, 3 }
  0x3e   : > { %343 = sbr.rel (%p1534_p5) target bundleno = 438 (0x1b6), region = 64  ;;  %s1631_s18 = sshll.u32 (!%p1534_p5), %s699_s11, 2 }
  0x3f   : > { %s2583_s19 = scalar_lea.vmem (!%p1534_p5), [#allocation3], %s1631_s18 }
  0x43   : > { %v1795_v0 = vld [vmem:[#allocation7 + $0x38] sm:$0xff]  ;;  %v1794_v1 = vld [vmem:[#allocation7 + $0x30] sm:$0xff]  ;;  %v1793_v2 = vld [vmem:[#allocation7 + $0x28] sm:$0xff] }
  0x44   : > { %476 = vmatpush.bf16.msra.mxu0 %v1795_v0  ;;  %1931 = vmatpush.bf16.msra.mxu2 %v1795_v0  ;;  %v1792_v3 = vld [vmem:[#allocation7 + $0x20] sm:$0xff]  ;;  %v1791_v4 = vld [vmem:[#allocation7 + $0x18] sm:$0xff]  ;;  %v1790_v5 = vld [vmem:[#allocation7 + $0x10] sm:$0xff] }
  0x45   : > { %v1789_v6 = vld [vmem:[#allocation7 + $0x8] sm:$0xff]  ;;  %v1788_v7 = vld [vmem:[#allocation7] sm:$0xff]  ;;  %v1803_v12 = vld [vmem:[#allocation9 + $0x38] sm:$0xff] }
  0x46   : > { %v1780_v8 = vld [vmem:[%s2541_s27] sm:$0xff]  ;;  %v1781_v10 = vld [vmem:[%s2541_s27 + $0x8] sm:$0xff]  ;;  %617 = vmatpush.bf16.msra.mxu1 %v1803_v12  ;;  %v1802_v13 = vld [vmem:[#allocation9 + $0x30] sm:$0xff]  ;;  %1939 = vmatpush.bf16.msra.mxu3 %v1803_v12 }
  0x47   : > { %v1784_v9 = vld [vmem:[%s2541_s27 + $0x20] sm:$0xff]  ;;  %v1785_v11 = vld [vmem:[%s2541_s27 + $0x28] sm:$0xff]  ;;  %v1782_v16 = vld [vmem:[%s2541_s27 + $0x10] sm:$0xff] }
  0x48   : > { %477 = vmatpush.bf16.msra.mxu0 %v1794_v1  ;;  %1932 = vmatpush.bf16.msra.mxu2 %v1794_v1  ;;  %v1801_v14 = vld [vmem:[#allocation9 + $0x28] sm:$0xff]  ;;  %v1800_v15 = vld [vmem:[#allocation9 + $0x20] sm:$0xff]  ;;  %v1786_v17 = vld [vmem:[%s2541_s27 + $0x30] sm:$0xff] }
  0x49   : > { %v1783_v18 = vld [vmem:[%s2541_s27 + $0x18] sm:$0xff]  ;;  %v1798_v21 = vld [vmem:[#allocation9 + $0x10] sm:$0xff]  ;;  %v1797_v22 = vld [vmem:[#allocation9 + $0x8] sm:$0xff] }
  0x4a   : > { %618 = vmatpush.bf16.msra.mxu1 %v1802_v13  ;;  %1940 = vmatpush.bf16.msra.mxu3 %v1802_v13  ;;  %v1787_v19 = vld [vmem:[%s2541_s27 + $0x38] sm:$0xff]  ;;  %v1796_v23 = vld [vmem:[#allocation9] sm:$0xff] }
  0x4b   : > { %v1799_v20 = vld [vmem:[#allocation9 + $0x18] sm:$0xff]  ;;  %v2078_v25 = vld [vmem:[%s2961_s2] ss:$0 sm:$0xff] }
  0x4c   : > { %478 = vmatpush.bf16.msra.mxu0 %v1793_v2  ;;  %1933 = vmatpush.bf16.msra.mxu2 %v1793_v2 }
  0x4e   : > { %619 = vmatpush.bf16.msra.mxu1 %v1801_v14  ;;  %1941 = vmatpush.bf16.msra.mxu3 %v1801_v14 }
  0x50   : > { %479 = vmatpush.bf16.msra.mxu0 %v1792_v3  ;;  %1934 = vmatpush.bf16.msra.mxu2 %v1792_v3 }
  0x52   : > { %620 = vmatpush.bf16.msra.mxu1 %v1800_v15  ;;  %1942 = vmatpush.bf16.msra.mxu3 %v1800_v15 }
  0x54   : > { %480 = vmatpush.bf16.msra.mxu0 %v1791_v4  ;;  %1935 = vmatpush.bf16.msra.mxu2 %v1791_v4 }
  0x56   : > { %621 = vmatpush.bf16.msra.mxu1 %v1799_v20  ;;  %1943 = vmatpush.bf16.msra.mxu3 %v1799_v20 }
  0x58   : > { %481 = vmatpush.bf16.msra.mxu0 %v1790_v5  ;;  %1936 = vmatpush.bf16.msra.mxu2 %v1790_v5 }
  0x5a   : > { %622 = vmatpush.bf16.msra.mxu1 %v1798_v21  ;;  %1944 = vmatpush.bf16.msra.mxu3 %v1798_v21 }
  0x5c   : > { %482 = vmatpush.bf16.msra.mxu0 %v1789_v6  ;;  %1937 = vmatpush.bf16.msra.mxu2 %v1789_v6 }
  0x5e   : > { %623 = vmatpush.bf16.msra.mxu1 %v1797_v22  ;;  %1945 = vmatpush.bf16.msra.mxu3 %v1797_v22 }
  0x60   : > { %483 = vmatpush.bf16.msra.mxu0 %v1788_v7  ;;  %1938 = vmatpush.bf16.msra.mxu2 %v1788_v7 }
  0x62   : > { %624 = vmatpush.bf16.msra.mxu1 %v1796_v23  ;;  %1946 = vmatpush.bf16.msra.mxu3 %v1796_v23 }
  0x63   : > { %484 = vmatmul.bf16.vlgmr.msra.gmra.mxu0 %v1780_v8  ;;  %504 = vmatmul.bf16.vlgmr.msra.gmra.mxu2 %v1784_v9 }
  0x73   : > { %489 = vmatmul.bf16.gmra.mxu0 %v1781_v10  ;;  %509 = vmatmul.bf16.gmra.mxu2 %v1785_v11 }
  0x83   : > { %494 = vmatmul.bf16.gmra.mxu0 %v1782_v16  ;;  %514 = vmatmul.bf16.gmra.mxu2 %v1786_v17  ;;  %v2573_v17 = vld [vmem:[%s2963_s4] ss:$0 sm:$0xff] }
  0x93   : > { %499 = vmatmul.bf16.gmra.mxu0 %v1783_v18  ;;  %519 = vmatmul.bf16.gmra.mxu2 %v1787_v19 }
  0xe0   : > { %v485_v24 = vpop.f32.mrf.mxu0 }
  0xe1   : > { %v486_v26 = vadd.f32 %v2078_v25, %v485_v24 }
  0xe3   : > { %v525_v29 = vmax.f32 %v486_v26, 0.0 }
  0xe6   : > { %v505_v27 = vpop.f32.mrf.mxu2 }
  0xe7   : > { %v506_v32 = vadd.f32 %v2078_v25, %v505_v27 }
  0xe8   : > { %v487_v28 = vpop.f32.mrf.mxu0 }
  0xe9   : > { %v488_v30 = vadd.f32 %v2078_v25, %v487_v28  ;;  %v533_v37 = vmax.f32 %v506_v32, 0.0 }
  0xeb   : > { %v526_v31 = vmax.f32 %v488_v30, 0.0 }
  0xed   : > { %v541_v33 = vpack.c.bf16 %v526_v31, %v525_v29 }
  0xee   : > { %v507_v34 = vpop.f32.mrf.mxu2 }
  0xef   : > { %v508_v35 = vadd.f32 %v2078_v25, %v507_v34  ;;  %625 = vmatmul.bf16.vlgmr.msra.gmra.mxu1 %v541_v33 }
  0xf0   : > { %v490_v36 = vpop.f32.mrf.mxu0 }
  0xf1   : > { %v534_v38 = vmax.f32 %v508_v35, 0.0  ;;  %v491_v40 = vadd.f32 %v2078_v25, %v490_v36 }
  0xf3   : > { %v545_v39 = vpack.c.bf16 %v534_v38, %v533_v37  ;;  %v527_v43 = vmax.f32 %v491_v40, 0.0 }
  0xf5   : > { %645 = vmatmul.bf16.vlgmr.msra.gmra.mxu3 %v545_v39 }
  0xf6   : > { %v510_v41 = vpop.f32.mrf.mxu2 }
  0xf7   : > { %v511_v46 = vadd.f32 %v2078_v25, %v510_v41 }
  0xf8   : > { %v492_v42 = vpop.f32.mrf.mxu0 }
  0xf9   : > { %v493_v44 = vadd.f32 %v2078_v25, %v492_v42  ;;  %v535_v51 = vmax.f32 %v511_v46, 0.0 }
  0xfb   : > { %v528_v45 = vmax.f32 %v493_v44, 0.0 }
  0xfd   : > { %v542_v47 = vpack.c.bf16 %v528_v45, %v527_v43 }
  0xfe   : > { %v512_v48 = vpop.f32.mrf.mxu2 }
  0xff   : > { %v513_v49 = vadd.f32 %v2078_v25, %v512_v48  ;;  %630 = vmatmul.bf16.gmra.mxu1 %v542_v47 }
 0x100   : > { %v495_v50 = vpop.f32.mrf.mxu0 }
 0x101   : > { %v536_v52 = vmax.f32 %v513_v49, 0.0  ;;  %v496_v54 = vadd.f32 %v2078_v25, %v495_v50 }
 0x103   : > { %v546_v53 = vpack.c.bf16 %v536_v52, %v535_v51  ;;  %v529_v57 = vmax.f32 %v496_v54, 0.0 }
 0x105   : > { %650 = vmatmul.bf16.gmra.mxu3 %v546_v53 }
 0x106   : > { %v515_v55 = vpop.f32.mrf.mxu2 }
 0x107   : > { %v516_v60 = vadd.f32 %v2078_v25, %v515_v55 }
 0x108   : > { %v497_v56 = vpop.f32.mrf.mxu0 }
 0x109   : > { %v498_v58 = vadd.f32 %v2078_v25, %v497_v56  ;;  %v537_v1 = vmax.f32 %v516_v60, 0.0 }
 0x10b   : > { %v530_v59 = vmax.f32 %v498_v58, 0.0 }
 0x10d   : > { %v543_v61 = vpack.c.bf16 %v530_v59, %v529_v57 }
 0x10e   : > { %v517_v62 = vpop.f32.mrf.mxu2 }
 0x10f   : > { %v518_v63 = vadd.f32 %v2078_v25, %v517_v62  ;;  %635 = vmatmul.bf16.gmra.mxu1 %v543_v61 }
 0x110   : > { %v500_v0 = vpop.f32.mrf.mxu0 }
 0x111   : > { %v538_v2 = vmax.f32 %v518_v63, 0.0  ;;  %v501_v4 = vadd.f32 %v2078_v25, %v500_v0 }
 0x113   : > { %v547_v3 = vpack.c.bf16 %v538_v2, %v537_v1  ;;  %v531_v7 = vmax.f32 %v501_v4, 0.0 }
 0x115   : > { %655 = vmatmul.bf16.gmra.mxu3 %v547_v3 }
 0x116   : > { %v520_v5 = vpop.f32.mrf.mxu2 }
 0x117   : > { %v521_v10 = vadd.f32 %v2078_v25, %v520_v5 }
 0x118   : > { %v502_v6 = vpop.f32.mrf.mxu0 }
 0x119   : > { %v503_v8 = vadd.f32 %v2078_v25, %v502_v6  ;;  %v539_v14 = vmax.f32 %v521_v10, 0.0 }
 0x11b   : > { %v532_v9 = vmax.f32 %v503_v8, 0.0 }
 0x11d   : > { %v544_v11 = vpack.c.bf16 %v532_v9, %v531_v7 }
 0x11e   : > { %v522_v12 = vpop.f32.mrf.mxu2 }
 0x11f   : > { %v523_v13 = vadd.f32 %v2078_v25, %v522_v12  ;;  %640 = vmatmul.bf16.gmra.mxu1 %v544_v11 }
 0x121   : > { %v540_v15 = vmax.f32 %v523_v13, 0.0 }
 0x123   : > { %v548_v16 = vpack.c.bf16 %v540_v15, %v539_v14 }
 0x125   : > { %660 = vmatmul.bf16.gmra.mxu3 %v548_v16 }
 0x16c   : > { %v626_v18 = vpop.f32.mrf.mxu1 }
 0x16d   : > { %v627_v19 = vadd.f32 %v2573_v17, %v626_v18 }
 0x16f   : > { %667 = vst [vmem:[%s2577_s7] sm:$0xff] %v627_v19 }
 0x174   : > { %v628_v20 = vpop.f32.mrf.mxu1 }
 0x175   : > { %v629_v21 = vadd.f32 %v2573_v17, %v628_v20 }
 0x177   : > { %668 = vst [vmem:[%s2577_s7 + $0x8] sm:$0xff] %v629_v21  ;;  %v1840_v22 = vpack.c.bf16 %v629_v21, %v627_v19 }
 0x178   : > { %v646_v23 = vpop.f32.mrf.mxu3 }
 0x179   : > { %1841 = vst [vmem:[%s2583_s19] sm:$0xff] %v1840_v22   ;;  %v647_v24 = vadd.f32 %v2573_v17, %v646_v23 }
 0x17b   : > { %675 = vst [vmem:[%s2577_s7 + $0x40] sm:$0xff] %v647_v24 }
 0x17c   : > { %v631_v25 = vpop.f32.mrf.mxu1 }
 0x17d   : > { %v632_v26 = vadd.f32 %v2573_v17, %v631_v25 }
 0x17f   : > { %669 = vst [vmem:[%s2577_s7 + $0x10] sm:$0xff] %v632_v26 }
 0x180   : > { %v648_v27 = vpop.f32.mrf.mxu3 }
 0x181   : > { %v649_v28 = vadd.f32 %v2573_v17, %v648_v27 }
 0x183   : > { %676 = vst [vmem:[%s2577_s7 + $0x48] sm:$0xff] %v649_v28  ;;  %v1860_v29 = vpack.c.bf16 %v649_v28, %v647_v24 }
 0x184   : > { %v633_v30 = vpop.f32.mrf.mxu1 }
 0x185   : > { %1920 = vst [vmem:[%s2583_s19 + $0x20] sm:$0xff] %v1860_v29   ;;  %v634_v31 = vadd.f32 %v2573_v17, %v633_v30 }
 0x187   : > { %670 = vst [vmem:[%s2577_s7 + $0x18] sm:$0xff] %v634_v31  ;;  %v1845_v32 = vpack.c.bf16 %v634_v31, %v632_v26 }
 0x188   : > { %v651_v33 = vpop.f32.mrf.mxu3 }
 0x189   : > { %1917 = vst [vmem:[%s2583_s19 + $0x8] sm:$0xff] %v1845_v32   ;;  %v652_v34 = vadd.f32 %v2573_v17, %v651_v33 }
 0x18b   : > { %677 = vst [vmem:[%s2577_s7 + $0x50] sm:$0xff] %v652_v34 }
 0x18c   : > { %v636_v35 = vpop.f32.mrf.mxu1 }
 0x18d   : > { %v637_v36 = vadd.f32 %v2573_v17, %v636_v35 }
 0x18f   : > { %671 = vst [vmem:[%s2577_s7 + $0x20] sm:$0xff] %v637_v36 }
 0x190   : > { %v653_v37 = vpop.f32.mrf.mxu3 }
 0x191   : > { %v654_v38 = vadd.f32 %v2573_v17, %v653_v37 }
 0x193   : > { %678 = vst [vmem:[%s2577_s7 + $0x58] sm:$0xff] %v654_v38  ;;  %v1865_v39 = vpack.c.bf16 %v654_v38, %v652_v34 }
 0x194   : > { %v638_v40 = vpop.f32.mrf.mxu1 }
 0x195   : > { %1921 = vst [vmem:[%s2583_s19 + $0x28] sm:$0xff] %v1865_v39   ;;  %v639_v41 = vadd.f32 %v2573_v17, %v638_v40 }
 0x197   : > { %672 = vst [vmem:[%s2577_s7 + $0x28] sm:$0xff] %v639_v41  ;;  %v1850_v42 = vpack.c.bf16 %v639_v41, %v637_v36 }
 0x198   : > { %v656_v43 = vpop.f32.mrf.mxu3 }
 0x199   : > { %1918 = vst [vmem:[%s2583_s19 + $0x10] sm:$0xff] %v1850_v42   ;;  %v657_v44 = vadd.f32 %v2573_v17, %v656_v43 }
 0x19b   : > { %679 = vst [vmem:[%s2577_s7 + $0x60] sm:$0xff] %v657_v44 }
 0x19c   : > { %v641_v45 = vpop.f32.mrf.mxu1 }
 0x19d   : > { %v642_v46 = vadd.f32 %v2573_v17, %v641_v45 }
 0x19f   : > { %673 = vst [vmem:[%s2577_s7 + $0x30] sm:$0xff] %v642_v46 }
 0x1a0   : > { %v658_v47 = vpop.f32.mrf.mxu3 }
 0x1a1   : > { %v659_v48 = vadd.f32 %v2573_v17, %v658_v47 }
 0x1a3   : > { %680 = vst [vmem:[%s2577_s7 + $0x68] sm:$0xff] %v659_v48  ;;  %v1870_v49 = vpack.c.bf16 %v659_v48, %v657_v44 }
 0x1a4   : > { %v643_v50 = vpop.f32.mrf.mxu1 }
 0x1a5   : > { %1922 = vst [vmem:[%s2583_s19 + $0x30] sm:$0xff] %v1870_v49   ;;  %v644_v51 = vadd.f32 %v2573_v17, %v643_v50 }
 0x1a7   : > { %674 = vst [vmem:[%s2577_s7 + $0x38] sm:$0xff] %v644_v51  ;;  %v1855_v52 = vpack.c.bf16 %v644_v51, %v642_v46 }
 0x1a8   : > { %v661_v53 = vpop.f32.mrf.mxu3 }
 0x1a9   : > { %1919 = vst [vmem:[%s2583_s19 + $0x18] sm:$0xff] %v1855_v52   ;;  %v662_v54 = vadd.f32 %v2573_v17, %v661_v53 }
 0x1ab   : > { %681 = vst [vmem:[%s2577_s7 + $0x70] sm:$0xff] %v662_v54 }
 0x1b0   : > { %v663_v55 = vpop.f32.mrf.mxu3 }
 0x1b1   : > { %v664_v56 = vadd.f32 %v2573_v17, %v663_v55 }
 0x1b3   : > { %682 = vst [vmem:[%s2577_s7 + $0x78] sm:$0xff] %v664_v56  ;;  %v1875_v57 = vpack.c.bf16 %v664_v56, %v662_v54 }
 0x1b5   : > { %1923 = vst [vmem:[%s2583_s19 + $0x38] sm:$0xff] %v1875_v57  }
 0x1b6 PF: > { %p1632_p1 = scmp.le.s32.totalorder %s2358_s25, 0 }
 0x1b7   : > { %s723_s8 = sadd.s32 (!%p1632_p1), 1, %s2358_s25  ;;  %p737_p4 = scmp.lt.s32.totalorder (!%p1632_p1), %s2358_s25, 0 }
 0x1b8   : > { %722 = sbr.rel (%p1632_p1) target bundleno = 1001 (0x3e9), region = 68  ;;  %p724_p7 = scmp.lt.s32.totalorder (!%p1632_p1), %s723_s8, 0 }
 0x1b9   : > { %s725_s14 = ssub.s32 (!%p1632_p1), 0, %s723_s8  ;;  %s738_s12 = ssub.s32 (!%p1632_p1), 0, %s2358_s25 }
 0x1ba   : > { %s1633_s9 = smin.u32 (!%p1632_p1), %s725_s14, %s723_s8  ;;  %s1637_s10 = smin.u32 (!%p1632_p1), %s2358_s25, %s738_s12 }
 0x1bb   : > { %s727_s15 = sand.u32 (!%p1632_p1), 1, %s1633_s9   ;;  %s740_s16 = sand.u32 (!%p1632_p1), 1, %s1637_s10  }
 0x1bc   : > { %s728_s13 = ssub.s32 (!%p1632_p1), 0, %s727_s15  ;;  %s741_s17 = ssub.s32 (!%p1632_p1), 0, %s740_s16 }
 0x1bd   : > { %s3009_s13 = smov (!%p724_p7, %s728_s13), %s727_s15  ;;  %s3011_s17 = smov (!%p737_p4, %s741_s17), %s740_s16 }
 0x1be   : > { %p1635_p8 = scmp.lt.s32.totalorder %s3009_s13, 0  ;;  %s734_s21 = sadd.s32 2, %s3009_s13 }
 0x1bf   : > { %p1639_p9 = scmp.lt.s32.totalorder %s3011_s17, 0  ;;  %s747_s1 = sadd.s32 2, %s3011_s17 }
 0x1c0   : > { %s3013_s21 = smov (!%p1635_p8, %s734_s21), %s3009_s13  ;;  %s2646_s30 = scalar_lea.vmem [#allocation10], %s2556_s5 }
 0x1c1   : > { %s1636_s3 = sshll.u32 %s3013_s21, 8  ;;  %s3015_s1 = smov (!%p1639_p9, %s747_s1), %s3011_s17  ;;  %v1646_v8 = vld [vmem:[%s2646_s30] sm:$0xf]  ;;  %v1822_v11 = vld [vmem:[%s2646_s30 + $0x4] sm:$0xf0] }
 0x1c2   : > { %s751_s29 = sshra.s32 %s1636_s3, 3  ;;  %s1640_s27 = sshll.u32 %s3015_s1, 8  ;;  %v1678_v12 = vld [vmem:[%s2646_s30 + $0x40] sm:$0xf]  ;;  %v1830_v13 = vld [vmem:[%s2646_s30 + $0x44] sm:$0xf0]  ;;  %v1647_v18 = vor.u32 %v1822_v11, %v1646_v8 }
 0x1c3   : > { %s1641_s6 = sshll.u32 %s751_s29, 2  ;;  %s2627_s24 = sadd.s32 %s1640_s27, %s2556_s5  ;;  %v1821_v14 = vld [vmem:[%s2646_s30 + $0x4] sm:$0xf]  ;;  %v1648_v15 = vld [vmem:[%s2646_s30 + $0x8] sm:$0xf0]  ;;  %v1679_v19 = vor.u32 %v1830_v13, %v1678_v12 }
 0x1c4   : > { %s2629_s28 = scalar_lea.vmem [#allocation3], %s1641_s6  ;;  %v1829_v16 = vld [vmem:[%s2646_s30 + $0x44] sm:$0xf]  ;;  %v1680_v17 = vld [vmem:[%s2646_s30 + $0x48] sm:$0xf0]  ;;  %v1651_v20 = vor.u32 %v1821_v14, %v1648_v15  ;;  %s2683_s7 = scalar_lea.vmem [#allocation2], %s2556_s5 }
 0x1c5   : > { %v1811_v58 = vld [vmem:[%s2629_s28 + $0x38] sm:$0xff]  ;;  %v1810_v60 = vld [vmem:[%s2629_s28 + $0x30] sm:$0xff]  ;;  %v1809_v62 = vld [vmem:[%s2629_s28 + $0x28] sm:$0xff]  ;;  %v1683_v21 = vor.u32 %v1829_v16, %v1680_v17  ;;  %p1772_p10 = scmp.ge.s32.totalorder %s2358_s25, 10 }
 0x1c6   : > { %v1819_v59 = vld [vmem:[%s2629_s28 + $0x78] sm:$0xff]  ;;  %984 = vmatpush.bf16.msra.mxu0 %v1811_v58  ;;  %1947 = vmatpush.bf16.msra.mxu2 %v1811_v58  ;;  %v1818_v61 = vld [vmem:[%s2629_s28 + $0x70] sm:$0xff]  ;;  %v1817_v63 = vld [vmem:[%s2629_s28 + $0x68] sm:$0xff]  ;;  %s1167_s11 = sshra.s32 (!%p1772_p10), %s2627_s24, 3 }
 0x1c7   : > { %1033 = vmatpush.bf16.msra.mxu1 %v1819_v59  ;;  %1955 = vmatpush.bf16.msra.mxu3 %v1819_v59  ;;  %v1808_v0 = vld [vmem:[%s2629_s28 + $0x20] sm:$0xff]  ;;  %v1807_v2 = vld [vmem:[%s2629_s28 + $0x18] sm:$0xff]  ;;  %v1806_v4 = vld [vmem:[%s2629_s28 + $0x10] sm:$0xff]  ;;  %s1773_s18 = sshll.u32 (!%p1772_p10), %s1167_s11, 2 }
 0x1c8   : > { %v1816_v1 = vld [vmem:[%s2629_s28 + $0x60] sm:$0xff]  ;;  %v1815_v3 = vld [vmem:[%s2629_s28 + $0x58] sm:$0xff]  ;;  %v1814_v5 = vld [vmem:[%s2629_s28 + $0x50] sm:$0xff]  ;;  %s1170_s19 = scalar_lea.vmem (!%p1772_p10), [#allocation3], %s1773_s18 }
 0x1c9   : > { %v1805_v6 = vld [vmem:[%s2629_s28 + $0x8] sm:$0xff]  ;;  %v1804_v9 = vld [vmem:[%s2629_s28] sm:$0xff]  ;;  %v1654_v22 = vld [vmem:[%s2646_s30 + $0x10] sm:$0xf] }
 0x1ca   : > { %985 = vmatpush.bf16.msra.mxu0 %v1810_v60  ;;  %1948 = vmatpush.bf16.msra.mxu2 %v1810_v60  ;;  %v1813_v7 = vld [vmem:[%s2629_s28 + $0x48] sm:$0xff]  ;;  %v1812_v10 = vld [vmem:[%s2629_s28 + $0x40] sm:$0xff]  ;;  %v1824_v23 = vld [vmem:[%s2646_s30 + $0x14] sm:$0xf0] }
 0x1cb   : > { %1034 = vmatpush.bf16.msra.mxu1 %v1818_v61  ;;  %1956 = vmatpush.bf16.msra.mxu3 %v1818_v61  ;;  %v1686_v24 = vld [vmem:[%s2646_s30 + $0x50] sm:$0xf]  ;;  %v1832_v25 = vld [vmem:[%s2646_s30 + $0x54] sm:$0xf0]  ;;  %v1823_v26 = vld [vmem:[%s2646_s30 + $0x14] sm:$0xf]  ;;  %v1655_v30 = vor.u32 %v1824_v23, %v1654_v22 }
 0x1cc   : > { %v1656_v27 = vld [vmem:[%s2646_s30 + $0x18] sm:$0xf0]  ;;  %v1831_v28 = vld [vmem:[%s2646_s30 + $0x54] sm:$0xf]  ;;  %v1687_v31 = vor.u32 %v1832_v25, %v1686_v24  ;;  %v1662_v34 = vld [vmem:[%s2646_s30 + $0x20] sm:$0xf] }
 0x1cd   : > { %v1688_v29 = vld [vmem:[%s2646_s30 + $0x58] sm:$0xf0]  ;;  %v1659_v32 = vor.u32 %v1823_v26, %v1656_v27  ;;  %v1826_v35 = vld [vmem:[%s2646_s30 + $0x24] sm:$0xf0]  ;;  %v1694_v36 = vld [vmem:[%s2646_s30 + $0x60] sm:$0xf] }
 0x1ce   : > { %986 = vmatpush.bf16.msra.mxu0 %v1809_v62  ;;  %1949 = vmatpush.bf16.msra.mxu2 %v1809_v62  ;;  %v1691_v33 = vor.u32 %v1831_v28, %v1688_v29  ;;  %v1834_v37 = vld [vmem:[%s2646_s30 + $0x64] sm:$0xf0]  ;;  %v1825_v38 = vld [vmem:[%s2646_s30 + $0x24] sm:$0xf]  ;;  %v1664_v39 = vld [vmem:[%s2646_s30 + $0x28] sm:$0xf0]  ;;  %v1663_v42 = vor.u32 %v1826_v35, %v1662_v34 }
 0x1cf   : > { %1035 = vmatpush.bf16.msra.mxu1 %v1817_v63  ;;  %1957 = vmatpush.bf16.msra.mxu3 %v1817_v63  ;;  %v1833_v40 = vld [vmem:[%s2646_s30 + $0x64] sm:$0xf]  ;;  %v1696_v41 = vld [vmem:[%s2646_s30 + $0x68] sm:$0xf0]  ;;  %v1695_v43 = vor.u32 %v1834_v37, %v1694_v36  ;;  %v1667_v44 = vor.u32 %v1825_v38, %v1664_v39  ;;  %v1670_v46 = vld [vmem:[%s2646_s30 + $0x30] sm:$0xf] }
 0x1d0   : > { %v1699_v45 = vor.u32 %v1833_v40, %v1696_v41  ;;  %v1828_v47 = vld [vmem:[%s2646_s30 + $0x34] sm:$0xf0]  ;;  %v1702_v48 = vld [vmem:[%s2646_s30 + $0x70] sm:$0xf]  ;;  %v1827_v50 = vld [vmem:[%s2646_s30 + $0x34] sm:$0xf] }
 0x1d1   : > { %v1836_v49 = vld [vmem:[%s2646_s30 + $0x74] sm:$0xf0]  ;;  %v1672_v51 = vld [vmem:[%s2646_s30 + $0x38] sm:$0xf0]  ;;  %v1835_v52 = vld [vmem:[%s2646_s30 + $0x74] sm:$0xf]  ;;  %v1671_v54 = vor.u32 %v1828_v47, %v1670_v46 }
 0x1d2   : > { %987 = vmatpush.bf16.msra.mxu0 %v1808_v0  ;;  %1950 = vmatpush.bf16.msra.mxu2 %v1808_v0  ;;  %v1704_v53 = vld [vmem:[%s2646_s30 + $0x78] sm:$0xf0]  ;;  %v1703_v55 = vor.u32 %v1836_v49, %v1702_v48  ;;  %v1675_v56 = vor.u32 %v1827_v50, %v1672_v51  ;;  %v1099_v58 = vld [vmem:[%s2683_s7] sm:$0xff]  ;;  %v1108_v14 = vld [vmem:[%s2683_s7 + $0x48] sm:$0xff] }
 0x1d3   : > { %1036 = vmatpush.bf16.msra.mxu1 %v1816_v1  ;;  %1958 = vmatpush.bf16.msra.mxu3 %v1816_v1  ;;  %v1707_v57 = vor.u32 %v1835_v52, %v1704_v53  ;;  %v1115_v62 = vmul.f32 0.1, %v1099_v58  ;;  %v1107_v0 = vld [vmem:[%s2683_s7 + $0x40] sm:$0xff]  ;;  %v1109_v28 = vld [vmem:[%s2683_s7 + $0x50] sm:$0xff] }
 0x1d4   : > { %v1125_v34 = vmul.f32 0.1, %v1109_v28  ;;  %v1103_v46 = vld [vmem:[%s2683_s7 + $0x20] sm:$0xff]  ;;  %v1106_v28 = vld [vmem:[%s2683_s7 + $0x38] sm:$0xff] }
 0x1d5   : > { %v1119_v53 = vmul.f32 0.1, %v1103_v46 }
 0x1d6   : > { %988 = vmatpush.bf16.msra.mxu0 %v1807_v2  ;;  %1951 = vmatpush.bf16.msra.mxu2 %v1807_v2 }
 0x1d7   : > { %1037 = vmatpush.bf16.msra.mxu1 %v1815_v3  ;;  %1959 = vmatpush.bf16.msra.mxu3 %v1815_v3 }
 0x1da   : > { %989 = vmatpush.bf16.msra.mxu0 %v1806_v4  ;;  %1952 = vmatpush.bf16.msra.mxu2 %v1806_v4  ;;  %v1100_v4 = vld [vmem:[%s2683_s7 + $0x8] sm:$0xff] }
 0x1db   : > { %1038 = vmatpush.bf16.msra.mxu1 %v1814_v5  ;;  %1960 = vmatpush.bf16.msra.mxu3 %v1814_v5  ;;  %v1116_v11 = vmul.f32 0.1, %v1100_v4 }
 0x1de   : > { %990 = vmatpush.bf16.msra.mxu0 %v1805_v6  ;;  %1953 = vmatpush.bf16.msra.mxu2 %v1805_v6  ;;  %v1123_v6 = vmul.f32 0.1, %v1107_v0 }
 0x1df   : > { %1039 = vmatpush.bf16.msra.mxu1 %v1813_v7  ;;  %1961 = vmatpush.bf16.msra.mxu3 %v1813_v7 }
 0x1e2   : > { %991 = vmatpush.bf16.msra.mxu0 %v1804_v9  ;;  %1954 = vmatpush.bf16.msra.mxu2 %v1804_v9 }
 0x1e3   : > { %1040 = vmatpush.bf16.msra.mxu1 %v1812_v10  ;;  %1962 = vmatpush.bf16.msra.mxu3 %v1812_v10 }
 0x1e5   : > { %992 = vmatmul.bf16.vlgmr.msra.gmra.mxu0 %v1647_v18  ;;  %1012 = vmatmul.bf16.vlgmr.msra.gmra.mxu2 %v1679_v19  ;;  %v1101_v18 = vld [vmem:[%s2683_s7 + $0x10] sm:$0xff] }
 0x1e6   : > { %1041 = vmatmul.bf16.vlgmr.msra.gmra.mxu1 %v1651_v20  ;;  %1061 = vmatmul.bf16.vlgmr.msra.gmra.mxu3 %v1683_v21  ;;  %v1124_v20 = vmul.f32 0.1, %v1108_v14  ;;  %v1117_v25 = vmul.f32 0.1, %v1101_v18 }
 0x1f5   : > { %997 = vmatmul.bf16.gmra.mxu0 %v1655_v30  ;;  %1017 = vmatmul.bf16.gmra.mxu2 %v1687_v31 }
 0x1f6   : > { %1046 = vmatmul.bf16.gmra.mxu1 %v1659_v32  ;;  %1066 = vmatmul.bf16.gmra.mxu3 %v1691_v33  ;;  %v1102_v32 = vld [vmem:[%s2683_s7 + $0x18] sm:$0xff] }
 0x1f7   : > { %v1118_v39 = vmul.f32 0.1, %v1102_v32 }
 0x205   : > { %1002 = vmatmul.bf16.gmra.mxu0 %v1663_v42  ;;  %1022 = vmatmul.bf16.gmra.mxu2 %v1695_v43  ;;  %v1110_v42 = vld [vmem:[%s2683_s7 + $0x58] sm:$0xff] }
 0x206   : > { %1051 = vmatmul.bf16.gmra.mxu1 %v1667_v44  ;;  %1071 = vmatmul.bf16.gmra.mxu3 %v1699_v45  ;;  %v1126_v48 = vmul.f32 0.1, %v1110_v42 }
 0x215   : > { %1007 = vmatmul.bf16.gmra.mxu0 %v1671_v54  ;;  %1027 = vmatmul.bf16.gmra.mxu2 %v1703_v55 }
 0x216   : > { %1056 = vmatmul.bf16.gmra.mxu1 %v1675_v56  ;;  %1076 = vmatmul.bf16.gmra.mxu3 %v1707_v57  ;;  %v1111_v56 = vld [vmem:[%s2683_s7 + $0x60] sm:$0xff] }
 0x262   : > { %v993_v59 = vpop.f32.mrf.mxu0 }
 0x263   : > { %v1042_v60 = vpop.f32.mrf.mxu1 }
 0x264   : > { %v1043_v61 = vadd.f32 %v1042_v60, %v993_v59  ;;  %v1104_v60 = vld [vmem:[%s2683_s7 + $0x28] sm:$0xff] }
 0x265   : > { %v1120_v4 = vmul.f32 0.1, %v1104_v60 }
 0x266   : > { %v1082_v63 = vmul.f32 0.9, %v1043_v61 }
 0x268   : > { %v2687_v1 = vadd.f32 %v1115_v62, %v1082_v63  ;;  %v1013_v2 = vpop.f32.mrf.mxu2  ;;  %v1127_v62 = vmul.f32 0.1, %v1111_v56 }
 0x269   : > { %v1062_v3 = vpop.f32.mrf.mxu3 }
 0x26a   : > { %v1063_v5 = vadd.f32 %v1062_v3, %v1013_v2  ;;  %v995_v7 = vpop.f32.mrf.mxu0 }
 0x26b   : > { %v1044_v8 = vpop.f32.mrf.mxu1 }
 0x26c   : > { %v1090_v9 = vmul.f32 0.9, %v1063_v5  ;;  %v1045_v10 = vadd.f32 %v1044_v8, %v995_v7  ;;  %v1112_v7 = vld [vmem:[%s2683_s7 + $0x68] sm:$0xff] }
 0x26d   : > { %v1128_v14 = vmul.f32 0.1, %v1112_v7 }
 0x26e   : > { %v2690_v12 = vadd.f32 %v1123_v6, %v1090_v9  ;;  %v1083_v13 = vmul.f32 0.9, %v1045_v10 }
 0x270   : > { %v2693_v15 = vadd.f32 %v1116_v11, %v1083_v13  ;;  %v1015_v16 = vpop.f32.mrf.mxu2  ;;  %v1105_v11 = vld [vmem:[%s2683_s7 + $0x30] sm:$0xff] }
 0x271   : > { %v1064_v17 = vpop.f32.mrf.mxu3 }
 0x272   : > { %v1065_v19 = vadd.f32 %v1064_v17, %v1015_v16  ;;  %v998_v21 = vpop.f32.mrf.mxu0 }
 0x273   : > { %v1047_v22 = vpop.f32.mrf.mxu1 }
 0x274   : > { %v1091_v23 = vmul.f32 0.9, %v1065_v19  ;;  %v1048_v24 = vadd.f32 %v1047_v22, %v998_v21 }
 0x276   : > { %v2696_v26 = vadd.f32 %v1124_v20, %v1091_v23  ;;  %v1084_v27 = vmul.f32 0.9, %v1048_v24  ;;  %v1121_v20 = vmul.f32 0.1, %v1105_v11  ;;  %v1113_v23 = vld [vmem:[%s2683_s7 + $0x70] sm:$0xff] }
 0x278   : > { %v2699_v29 = vadd.f32 %v1117_v25, %v1084_v27  ;;  %v1018_v30 = vpop.f32.mrf.mxu2 }
 0x279   : > { %v1067_v31 = vpop.f32.mrf.mxu3 }
 0x27a   : > { %v1068_v33 = vadd.f32 %v1067_v31, %v1018_v30  ;;  %v1000_v35 = vpop.f32.mrf.mxu0  ;;  %v1129_v31 = vmul.f32 0.1, %v1113_v23 }
 0x27b   : > { %v1049_v36 = vpop.f32.mrf.mxu1 }
 0x27c   : > { %v1092_v37 = vmul.f32 0.9, %v1068_v33  ;;  %v1050_v38 = vadd.f32 %v1049_v36, %v1000_v35  ;;  %v1122_v36 = vmul.f32 0.1, %v1106_v28 }
 0x27e   : > { %v2702_v40 = vadd.f32 %v1125_v34, %v1092_v37  ;;  %v1085_v41 = vmul.f32 0.9, %v1050_v38 }
 0x280   : > { %v2705_v43 = vadd.f32 %v1118_v39, %v1085_v41  ;;  %v1020_v44 = vpop.f32.mrf.mxu2  ;;  %v1114_v39 = vld [vmem:[%s2683_s7 + $0x78] sm:$0xff] }
 0x281   : > { %v1069_v45 = vpop.f32.mrf.mxu3  ;;  %v1130_v46 = vmul.f32 0.1, %v1114_v39 }
 0x282   : > { %v1070_v47 = vadd.f32 %v1069_v45, %v1020_v44  ;;  %v1003_v49 = vpop.f32.mrf.mxu0 }
 0x283   : > { %v1052_v50 = vpop.f32.mrf.mxu1 }
 0x284   : > { %v1093_v51 = vmul.f32 0.9, %v1070_v47  ;;  %v1053_v52 = vadd.f32 %v1052_v50, %v1003_v49 }
 0x286   : > { %v2708_v54 = vadd.f32 %v1126_v48, %v1093_v51  ;;  %v1086_v55 = vmul.f32 0.9, %v1053_v52 }
 0x288   : > { %v2711_v57 = vadd.f32 %v1119_v53, %v1086_v55  ;;  %v1023_v58 = vpop.f32.mrf.mxu2 }
 0x289   : > { %v1072_v59 = vpop.f32.mrf.mxu3 }
 0x28a   : > { %v1073_v61 = vadd.f32 %v1072_v59, %v1023_v58  ;;  %v1005_v63 = vpop.f32.mrf.mxu0 }
 0x28b   : > { %v1054_v0 = vpop.f32.mrf.mxu1 }
 0x28c   : > { %v1094_v2 = vmul.f32 0.9, %v1073_v61  ;;  %v1055_v3 = vadd.f32 %v1054_v0, %v1005_v63 }
 0x28e   : > { %v2714_v5 = vadd.f32 %v1127_v62, %v1094_v2  ;;  %v1087_v6 = vmul.f32 0.9, %v1055_v3 }
 0x290   : > { %v2717_v8 = vadd.f32 %v1120_v4, %v1087_v6  ;;  %v1025_v9 = vpop.f32.mrf.mxu2 }
 0x291   : > { %v1074_v10 = vpop.f32.mrf.mxu3 }
 0x292   : > { %v1075_v13 = vadd.f32 %v1074_v10, %v1025_v9  ;;  %v1008_v16 = vpop.f32.mrf.mxu0 }
 0x293   : > { %v1057_v17 = vpop.f32.mrf.mxu1 }
 0x294   : > { %v1095_v18 = vmul.f32 0.9, %v1075_v13  ;;  %v1058_v19 = vadd.f32 %v1057_v17, %v1008_v16 }
 0x296   : > { %v2720_v21 = vadd.f32 %v1128_v14, %v1095_v18  ;;  %v1088_v22 = vmul.f32 0.9, %v1058_v19 }
 0x298   : > { %v1137_v24 = vadd.f32 %v1121_v20, %v1088_v22  ;;  %v1028_v25 = vpop.f32.mrf.mxu2 }
 0x299   : > { %v1077_v27 = vpop.f32.mrf.mxu3 }
 0x29a   : > { %v1078_v30 = vadd.f32 %v1077_v27, %v1028_v25  ;;  %v1010_v32 = vpop.f32.mrf.mxu0 }
 0x29b   : > { %v1059_v33 = vpop.f32.mrf.mxu1 }
 0x29c   : > { %v1096_v34 = vmul.f32 0.9, %v1078_v30  ;;  %v1060_v35 = vadd.f32 %v1059_v33, %v1010_v32 }
 0x29e   : > { %v1145_v37 = vadd.f32 %v1129_v31, %v1096_v34  ;;  %v1089_v38 = vmul.f32 0.9, %v1060_v35 }
 0x2a0   : > { %v1138_v41 = vadd.f32 %v1122_v36, %v1089_v38  ;;  %v1030_v42 = vpop.f32.mrf.mxu2 }
 0x2a1   : > { %v1079_v44 = vpop.f32.mrf.mxu3 }
 0x2a2   : > { %v1080_v45 = vadd.f32 %v1079_v44, %v1030_v42  ;;  %1150 = sbr.rel (%p1772_p10) target bundleno = 689 (0x2b1), region = 72 }
 0x2a4   : > { %v1097_v47 = vmul.f32 0.9, %v1080_v45 }
 0x2a6   : > { %v1146_v48 = vadd.f32 %v1130_v46, %v1097_v47 }
 0x2a7   : > { %v1880_v49 = vpack.c.bf16 %v2693_v15, %v2687_v1  ;;  %v1885_v50 = vpack.c.bf16 %v2705_v43, %v2699_v29  ;;  %v1890_v51 = vpack.c.bf16 %v2717_v8, %v2711_v57  ;;  %v1895_v52 = vpack.c.bf16 %v1138_v41, %v1137_v24 }
 0x2a8   : > { %v1900_v53 = vpack.c.bf16 %v2696_v26, %v2690_v12  ;;  %v1905_v55 = vpack.c.bf16 %v2708_v54, %v2702_v40  ;;  %v1910_v56 = vpack.c.bf16 %v2720_v21, %v2714_v5  ;;  %v1915_v58 = vpack.c.bf16 %v1146_v48, %v1145_v37 }
 0x2a9   : > { %1881 = vst [vmem:[%s1170_s19] sm:$0xff] %v1880_v49  }
 0x2aa   : > { %1924 = vst [vmem:[%s1170_s19 + $0x8] sm:$0xff] %v1885_v50  }
 0x2ab   : > { %1925 = vst [vmem:[%s1170_s19 + $0x10] sm:$0xff] %v1890_v51  }
 0x2ac   : > { %1926 = vst [vmem:[%s1170_s19 + $0x18] sm:$0xff] %v1895_v52  }
 0x2ad   : > { %1927 = vst [vmem:[%s1170_s19 + $0x20] sm:$0xff] %v1900_v53  }
 0x2ae   : > { %1928 = vst [vmem:[%s1170_s19 + $0x28] sm:$0xff] %v1905_v55  }
 0x2af   : > { %1929 = vst [vmem:[%s1170_s19 + $0x30] sm:$0xff] %v1910_v56  }
 0x2b0   : > { %1930 = vst [vmem:[%s1170_s19 + $0x38] sm:$0xff] %v1915_v58  }
 0x2b1 PF: > { %p1774_p11 = scmp.ne.s32.totalorder %s2358_s25, 10 }
 0x2b2   : > { %s2898_s25 = scalar_lea.vmem (!%p1774_p11), [#allocation12], %s2556_s5 }
 0x2b3   : > { %1190 = sbr.rel (%p1774_p11) target bundleno = 1001 (0x3e9), region = 76 }
 0x2b8   : > { %v1191_v59 = vlaneseq }
 0x2ba   : > { %v2740_v60 = vand.u32 127, %v1191_v59 }
 0x2bc   : > { %vm1193_vm0 = vcmp.lt.s32.totalorder %v2740_v60, 8 }
 0x2bd   : > { %v1198_v61 = vsel %vm1193_vm0, %v2711_v57, -inf  ;;  %v1196_v62 = vsel %vm1193_vm0, %v2699_v29, -inf  ;;  %v1194_v63 = vsel %vm1193_vm0, %v2687_v1, -inf  ;;  %v1199_v0 = vsel %vm1193_vm0, %v2717_v8, -inf }
 0x2be   : > { %1218 = vmax.xlane.f32.xlu2 %v1198_v61  ;;  %1214 = vmax.xlane.f32.xlu1 %v1196_v62  ;;  %v1197_v2 = vsel %vm1193_vm0, %v2705_v43, -inf  ;;  %v1195_v57 = vsel %vm1193_vm0, %v2693_v15, -inf  ;;  %v1202_v1 = vsel %vm1193_vm0, %v2690_v12, -inf  ;;  %v1201_v29 = vsel %vm1193_vm0, %v1138_v41, -inf }
 0x2bf   : > { %1210 = vmax.xlane.f32.xlu0 %v1194_v63  ;;  %v1200_v3 = vsel %vm1193_vm0, %v1137_v24, -inf  ;;  %v2771_v15 = vsel %vm1193_vm0, %v2708_v54, -inf  ;;  %v2776_v43 = vsel %vm1193_vm0, %v2702_v40, -inf  ;;  %v2781_v12 = vsel %vm1193_vm0, %v2696_v26, -inf }
 0x2c0   : > { %v2788_v54 = vsel %vm1193_vm0, %v1145_v37, -inf  ;;  %v2793_v40 = vsel %vm1193_vm0, %v2720_v21, -inf  ;;  %v2798_v26 = vsel %vm1193_vm0, %v2714_v5, -inf  ;;  %v2805_v4 = vsel %vm1193_vm0, %v1146_v48, -inf }
 0x2c6   : > { %1220 = vmax.xlane.f32.xlu2 %v1199_v0  ;;  %1216 = vmax.xlane.f32.xlu1 %v1197_v2 }
 0x2c7   : > { %1212 = vmax.xlane.f32.xlu0 %v1195_v57 }
 0x2ce   : > { %1226 = vmax.xlane.f32.xlu2 %v1202_v1  ;;  %1224 = vmax.xlane.f32.xlu1 %v1201_v29 }
 0x2cf   : > { %1222 = vmax.xlane.f32.xlu0 %v1200_v3 }
 0x2d6   : > { %1232 = vmax.xlane.f32.xlu2 %v2771_v15  ;;  %1230 = vmax.xlane.f32.xlu1 %v2776_v43 }
 0x2d7   : > { %1228 = vmax.xlane.f32.xlu0 %v2781_v12 }
 0x2de   : > { %1238 = vmax.xlane.f32.xlu2 %v2788_v54  ;;  %1236 = vmax.xlane.f32.xlu1 %v2793_v40 }
 0x2df   : > { %1234 = vmax.xlane.f32.xlu0 %v2798_v26 }
 0x2e7   : > { %1240 = vmax.xlane.f32.xlu0 %v2805_v4 }
 0x331   : > { %v1219_v6 = vpop.xlane.xlu2 %1218  ;;  %v1215_v7 = vpop.xlane.xlu1 %1214 }
 0x332   : > { %v2808_v8 = vsub.f32 %v1196_v62, %v1215_v7  ;;  %v1211_v9 = vpop.xlane.xlu0 %1210  ;;  %v2822_v23 = vsub.f32 %v1198_v61, %v1219_v6 }
 0x333   : > { %v2810_v10 = vsub.f32 %v1194_v63, %v1211_v9 }
 0x334   : > { %v1262_v5 = vmul.f32 1.442695, %v2808_v8  ;;  %v1266_v30 = vmul.f32 1.442695, %v2822_v23 }
 0x335   : > { %v1258_v11 = vmul.f32 1.442695, %v2810_v10 }
 0x336   : > { %2080 = vpow2.f32 %v1262_v5 }
 0x337   : > { %2082 = vpow2.f32 %v1258_v11 }
 0x339   : > { %v1221_v13 = vpop.xlane.xlu2 %1220  ;;  %v1217_v14 = vpop.xlane.xlu1 %1216 }
 0x33a   : > { %v2814_v16 = vsub.f32 %v1199_v0, %v1221_v13  ;;  %v2816_v17 = vsub.f32 %v1197_v2, %v1217_v14  ;;  %v1213_v18 = vpop.xlane.xlu0 %1212 }
 0x33b   : > { %v2818_v19 = vsub.f32 %v1195_v57, %v1213_v18 }
 0x33c   : > { %v1268_v20 = vmul.f32 1.442695, %v2814_v16  ;;  %v1264_v21 = vmul.f32 1.442695, %v2816_v17  ;;  %v2081_v22 = vpop.eup %2080 }
 0x33d   : > { %v1260_v24 = vmul.f32 1.442695, %v2818_v19  ;;  %v2083_v25 = vpop.eup %2082  ;;  %v1292_v27 = vsel %vm1193_vm0, %v2081_v22, 0.0 }
 0x33e   : > { %2084 = vpow2.f32 %v1268_v20  ;;  %1310 = vadd.xlane.f32.xlu0 %v1292_v27  ;;  %v1290_v28 = vsel %vm1193_vm0, %v2083_v25, 0.0 }
 0x33f   : > { %2086 = vpow2.f32 %v1264_v21  ;;  %1306 = vadd.xlane.f32.xlu1 %v1290_v28 }
 0x340   : > { %2088 = vpow2.f32 %v1260_v24 }
 0x341   : > { %v1227_v31 = vpop.xlane.xlu2 %1226  ;;  %v1225_v32 = vpop.xlane.xlu1 %1224  ;;  %2090 = vpow2.f32 %v1266_v30 }
 0x342   : > { %v2830_v33 = vsub.f32 %v1202_v1, %v1227_v31  ;;  %v1223_v34 = vpop.xlane.xlu0 %1222  ;;  %v2835_v38 = vsub.f32 %v1201_v29, %v1225_v32 }
 0x343   : > { %v2832_v35 = vsub.f32 %v1200_v3, %v1223_v34 }
 0x344   : > { %v2085_v36 = vpop.eup %2084  ;;  %v1274_v37 = vmul.f32 1.442695, %v2830_v33  ;;  %v1272_v47 = vmul.f32 1.442695, %v2835_v38 }
 0x345   : > { %v2087_v39 = vpop.eup %2086  ;;  %v1270_v41 = vmul.f32 1.442695, %v2832_v35  ;;  %v1295_v42 = vsel %vm1193_vm0, %v2085_v36, 0.0 }
 0x346   : > { %v2089_v44 = vpop.eup %2088  ;;  %2092 = vpow2.f32 %v1274_v37  ;;  %v1293_v45 = vsel %vm1193_vm0, %v2087_v39, 0.0  ;;  %1316 = vadd.xlane.f32.xlu0 %v1295_v42 }
 0x347   : > { %2094 = vpow2.f32 %v1270_v41  ;;  %v1291_v46 = vsel %vm1193_vm0, %v2089_v44, 0.0  ;;  %1312 = vadd.xlane.f32.xlu1 %v1293_v45  ;;  %v2091_v52 = vpop.eup %2090 }
 0x348   : > { %1308 = vadd.xlane.f32.xlu2 %v1291_v46  ;;  %2096 = vpow2.f32 %v1272_v47  ;;  %v1294_v0 = vsel %vm1193_vm0, %v2091_v52, 0.0 }
 0x349   : > { %v1233_v48 = vpop.xlane.xlu2 %1232  ;;  %v1231_v49 = vpop.xlane.xlu1 %1230 }
 0x34a   : > { %v2846_v50 = vsub.f32 %v2771_v15, %v1233_v48  ;;  %v1229_v51 = vpop.xlane.xlu0 %1228  ;;  %v2853_v58 = vsub.f32 %v2776_v43, %v1231_v49 }
 0x34b   : > { %v2849_v53 = vsub.f32 %v2781_v12, %v1229_v51 }
 0x34c   : > { %v2093_v55 = vpop.eup %2092  ;;  %v1280_v56 = vmul.f32 1.442695, %v2846_v50  ;;  %v1278_v2 = vmul.f32 1.442695, %v2853_v58 }
 0x34d   : > { %v2095_v59 = vpop.eup %2094  ;;  %v1276_v61 = vmul.f32 1.442695, %v2849_v53  ;;  %v1298_v62 = vsel %vm1193_vm0, %v2093_v55, 0.0 }
 0x34e   : > { %2098 = vpow2.f32 %v1280_v56  ;;  %v1296_v63 = vsel %vm1193_vm0, %v2095_v59, 0.0  ;;  %1322 = vadd.xlane.f32.xlu0 %v1298_v62  ;;  %v2097_v29 = vpop.eup %2096 }
 0x34f   : > { %2100 = vpow2.f32 %v1276_v61  ;;  %1318 = vadd.xlane.f32.xlu1 %v1296_v63 }
 0x350   : > { %1314 = vadd.xlane.f32.xlu2 %v1294_v0  ;;  %2102 = vpow2.f32 %v1278_v2 }
 0x351   : > { %v1239_v57 = vpop.xlane.xlu2 %1238  ;;  %v1237_v1 = vpop.xlane.xlu1 %1236 }
 0x352   : > { %v2864_v3 = vsub.f32 %v2788_v54, %v1239_v57  ;;  %v1235_v15 = vpop.xlane.xlu0 %1234  ;;  %v2871_v7 = vsub.f32 %v2793_v40, %v1237_v1  ;;  %v1297_v54 = vsel %vm1193_vm0, %v2097_v29, 0.0 }
 0x353   : > { %v2867_v43 = vsub.f32 %v2798_v26, %v1235_v15 }
 0x354   : > { %v2099_v12 = vpop.eup %2098  ;;  %v1286_v6 = vmul.f32 1.442695, %v2864_v3  ;;  %v1284_v40 = vmul.f32 1.442695, %v2871_v7 }
 0x355   : > { %v2101_v9 = vpop.eup %2100  ;;  %v1282_v5 = vmul.f32 1.442695, %v2867_v43  ;;  %v1301_v11 = vsel %vm1193_vm0, %v2099_v12, 0.0 }
 0x356   : > { %2104 = vpow2.f32 %v1286_v6  ;;  %v1299_v26 = vsel %vm1193_vm0, %v2101_v9, 0.0  ;;  %1328 = vadd.xlane.f32.xlu0 %v1301_v11  ;;  %v2103_v13 = vpop.eup %2102 }
 0x357   : > { %2106 = vpow2.f32 %v1282_v5  ;;  %1324 = vadd.xlane.f32.xlu1 %v1299_v26  ;;  %v1300_v25 = vsel %vm1193_vm0, %v2103_v13, 0.0 }
 0x358   : > { %1320 = vadd.xlane.f32.xlu2 %v1297_v54  ;;  %2108 = vpow2.f32 %v1284_v40 }
 0x35a   : > { %v1241_v14 = vpop.xlane.xlu0 %1240 }
 0x35b   : > { %v2882_v18 = vsub.f32 %v2805_v4, %v1241_v14 }
 0x35c   : > { %v2105_v20 = vpop.eup %2104 }
 0x35d   : > { %v2107_v21 = vpop.eup %2106  ;;  %v1288_v22 = vmul.f32 1.442695, %v2882_v18  ;;  %v1304_v24 = vsel %vm1193_vm0, %v2105_v20, 0.0 }
 0x35e   : > { %v1302_v27 = vsel %vm1193_vm0, %v2107_v21, 0.0  ;;  %1334 = vadd.xlane.f32.xlu0 %v1304_v24  ;;  %v2109_v4 = vpop.eup %2108 }
 0x35f   : > { %2110 = vpow2.f32 %v1288_v22  ;;  %1330 = vadd.xlane.f32.xlu1 %v1302_v27  ;;  %v1303_v30 = vsel %vm1193_vm0, %v2109_v4, 0.0 }
 0x360   : > { %1326 = vadd.xlane.f32.xlu2 %v1300_v25 }
 0x365   : > { %v2111_v28 = vpop.eup %2110 }
 0x366   : > { %v1305_v31 = vsel %vm1193_vm0, %v2111_v28, 0.0 }
 0x367   : > { %1336 = vadd.xlane.f32.xlu1 %v1305_v31 }
 0x368   : > { %1332 = vadd.xlane.f32.xlu2 %v1303_v30 }
 0x3b1   : > { %v1311_v32 = vpop.xlane.xlu0 %1310 }
 0x3b2   : > { %v1307_v34 = vpop.xlane.xlu1 %1306  ;;  %2112 = vlog2.f32 %v1311_v32 }
 0x3b3   : > { %2114 = vlog2.f32 %v1307_v34 }
 0x3b8   : > { %v2113_v36 = vpop.eup %2112 }
 0x3b9   : > { %v2115_v37 = vpop.eup %2114  ;;  %v1343_v39 = vmul.f32 0.6931472, %v2113_v36  ;;  %v1317_v41 = vpop.xlane.xlu0 %1316 }
 0x3ba   : > { %v1339_v42 = vmul.f32 0.6931472, %v2115_v37  ;;  %v1313_v44 = vpop.xlane.xlu1 %1312  ;;  %2116 = vlog2.f32 %v1317_v41 }
 0x3bb   : > { %v1309_v45 = vpop.xlane.xlu2 %1308  ;;  %v1372_v46 = vsub.f32 %v2808_v8, %v1343_v39  ;;  %2118 = vlog2.f32 %v1313_v44 }
 0x3bc   : > { %v1370_v60 = vsub.f32 %v2810_v10, %v1339_v42  ;;  %2120 = vlog2.f32 %v1309_v45 }
 0x3bd   : > { %1389 = vst [vmem:[%s2898_s25 + $0x10] sm:$0xff] %v1372_v46 }
 0x3be   : > { %1387 = vst [vmem:[%s2898_s25] sm:$0xff] %v1370_v60 }
 0x3c0   : > { %v2117_v47 = vpop.eup %2116 }
 0x3c1   : > { %v2119_v48 = vpop.eup %2118  ;;  %v1349_v49 = vmul.f32 0.6931472, %v2117_v47  ;;  %v1323_v51 = vpop.xlane.xlu0 %1322 }
 0x3c2   : > { %v2121_v52 = vpop.eup %2120  ;;  %v1345_v55 = vmul.f32 0.6931472, %v2119_v48  ;;  %v1319_v56 = vpop.xlane.xlu1 %1318  ;;  %2122 = vlog2.f32 %v1323_v51 }
 0x3c3   : > { %v1315_v8 = vpop.xlane.xlu2 %1314  ;;  %v1341_v10 = vmul.f32 0.6931472, %v2121_v52  ;;  %v1375_v59 = vsub.f32 %v2814_v16, %v1349_v49 }
 0x3c4   : > { %2124 = vlog2.f32 %v1315_v8  ;;  %v1373_v61 = vsub.f32 %v2816_v17, %v1345_v55 }
 0x3c5   : > { %2126 = vlog2.f32 %v1319_v56  ;;  %v1371_v62 = vsub.f32 %v2818_v19, %v1341_v10  ;;  %1392 = vst [vmem:[%s2898_s25 + $0x28] sm:$0xff] %v1375_v59 }
 0x3c6   : > { %1390 = vst [vmem:[%s2898_s25 + $0x18] sm:$0xff] %v1373_v61 }
 0x3c7   : > { %1388 = vst [vmem:[%s2898_s25 + $0x8] sm:$0xff] %v1371_v62 }
 0x3c8   : > { %v2123_v63 = vpop.eup %2122 }
 0x3c9   : > { %v1355_v2 = vmul.f32 0.6931472, %v2123_v63  ;;  %v1329_v57 = vpop.xlane.xlu0 %1328 }
 0x3ca   : > { %v2125_v0 = vpop.eup %2124  ;;  %v1325_v16 = vpop.xlane.xlu1 %1324  ;;  %2128 = vlog2.f32 %v1329_v57 }
 0x3cb   : > { %v2127_v1 = vpop.eup %2126  ;;  %v1347_v29 = vmul.f32 0.6931472, %v2125_v0  ;;  %v1321_v15 = vpop.xlane.xlu2 %1320  ;;  %v1378_v17 = vsub.f32 %v2830_v33, %v1355_v2 }
 0x3cc   : > { %v1351_v12 = vmul.f32 0.6931472, %v2127_v1  ;;  %2130 = vlog2.f32 %v1321_v15 }
 0x3cd   : > { %v1374_v19 = vsub.f32 %v2822_v23, %v1347_v29  ;;  %2132 = vlog2.f32 %v1325_v16  ;;  %1395 = vst [vmem:[%s2898_s25 + $0x40] sm:$0xff] %v1378_v17 }
 0x3ce   : > { %v1376_v6 = vsub.f32 %v2832_v35, %v1351_v12 }
 0x3cf   : > { %1391 = vst [vmem:[%s2898_s25 + $0x20] sm:$0xff] %v1374_v19 }
 0x3d0   : > { %1393 = vst [vmem:[%s2898_s25 + $0x30] sm:$0xff] %v1376_v6  ;;  %v2129_v9 = vpop.eup %2128 }
 0x3d1   : > { %v1361_v11 = vmul.f32 0.6931472, %v2129_v9  ;;  %v1335_v54 = vpop.xlane.xlu0 %1334 }
 0x3d2   : > { %v2131_v5 = vpop.eup %2130  ;;  %v1331_v33 = vpop.xlane.xlu1 %1330  ;;  %2134 = vlog2.f32 %v1335_v54 }
 0x3d3   : > { %v2133_v26 = vpop.eup %2132  ;;  %v1353_v40 = vmul.f32 0.6931472, %v2131_v5  ;;  %v1327_v13 = vpop.xlane.xlu2 %1326  ;;  %v1381_v23 = vsub.f32 %v2846_v50, %v1361_v11 }
 0x3d4   : > { %v1357_v14 = vmul.f32 0.6931472, %v2133_v26  ;;  %2136 = vlog2.f32 %v1327_v13 }
 0x3d5   : > { %v1377_v35 = vsub.f32 %v2835_v38, %v1353_v40  ;;  %2138 = vlog2.f32 %v1331_v33  ;;  %1398 = vst [vmem:[%s2898_s25 + $0x58] sm:$0xff] %v1381_v23 }
 0x3d6   : > { %v1379_v20 = vsub.f32 %v2849_v53, %v1357_v14 }
 0x3d7   : > { %1394 = vst [vmem:[%s2898_s25 + $0x38] sm:$0xff] %v1377_v35 }
 0x3d8   : > { %1396 = vst [vmem:[%s2898_s25 + $0x48] sm:$0xff] %v1379_v20  ;;  %v2135_v21 = vpop.eup %2134 }
 0x3d9   : > { %v1367_v24 = vmul.f32 0.6931472, %v2135_v21 }
 0x3da   : > { %v2137_v22 = vpop.eup %2136  ;;  %v1337_v28 = vpop.xlane.xlu1 %1336 }
 0x3db   : > { %v2139_v25 = vpop.eup %2138  ;;  %v1359_v27 = vmul.f32 0.6931472, %v2137_v22  ;;  %v1333_v4 = vpop.xlane.xlu2 %1332  ;;  %v1384_v38 = vsub.f32 %v2864_v3, %v1367_v24 }
 0x3dc   : > { %v1363_v50 = vmul.f32 0.6931472, %v2139_v25  ;;  %2140 = vlog2.f32 %v1333_v4 }
 0x3dd   : > { %v1380_v53 = vsub.f32 %v2853_v58, %v1359_v27  ;;  %2142 = vlog2.f32 %v1337_v28  ;;  %1401 = vst [vmem:[%s2898_s25 + $0x70] sm:$0xff] %v1384_v38 }
 0x3de   : > { %v1382_v30 = vsub.f32 %v2867_v43, %v1363_v50 }
 0x3df   : > { %1397 = vst [vmem:[%s2898_s25 + $0x50] sm:$0xff] %v1380_v53 }
 0x3e0   : > { %1399 = vst [vmem:[%s2898_s25 + $0x60] sm:$0xff] %v1382_v30 }
 0x3e2   : > { %v2141_v31 = vpop.eup %2140 }
 0x3e3   : > { %v2143_v32 = vpop.eup %2142  ;;  %v1365_v34 = vmul.f32 0.6931472, %v2141_v31 }
 0x3e4   : > { %v1369_v36 = vmul.f32 0.6931472, %v2143_v32 }
 0x3e5   : > { %v1383_v37 = vsub.f32 %v2871_v7, %v1365_v34 }
 0x3e6   : > { %v1385_v39 = vsub.f32 %v2882_v18, %v1369_v36 }
 0x3e7   : > { %1400 = vst [vmem:[%s2898_s25 + $0x68] sm:$0xff] %v1383_v37 }
 0x3e8   : > { %1402 = vst [vmem:[%s2898_s25 + $0x78] sm:$0xff] %v1385_v39 }
 0x3e9 PF: > { %s2991_s5 = sld [smem:[#allocation19_spill]]  ;;  %s2379_s10 = smov [#allocation12]  }
 0x3ea   : > { %s2993_s12 = sld [smem:[#allocation24_spill]]  ;;  %s1408_s13 = sshll.u32 %s2379_s10, 4  ;;  %s1409_s13 = int_to_ptr.vmem [resolvable:$true] %s1408_s13 }
 0x3eb   : > { %s2380_s16 = smov 128   ;;  %s2381_s17 = smov 8  }
 0x3ef   : > { %s2992_s8 = sadd.s32 4294967295, %s2991_s5  }
 0x3f0   : > { %p2002_p12 = scmp.eq.s32.totalorder %s2992_s8, 21  ;;  %s1410_s15 = sshll.u32 %s2993_s12, 4  ;;  %s1411_s15 = int_to_ptr.hbm [resolvable:$true] %s1410_s15 }
 0x3f2   : > { %1978 = dma.vmem_to_hbm [thread:$0]  (%p2002_p12), %s1409_s13, 4096, %s1411_s15, [#allocation6], %s2380_s16, %s2380_s16, %s2381_s17  }
 0x3f3   : > { %2337 = dma.done.wait (%p2002_p12), [#allocation6], 4096  }
 0x3f4   : > { %2339 = vsyncadd (%p2002_p12), [#allocation6], 4294963200 }
 0x3f5 PF: > { %s2994_s21 = sld [smem:[#allocation19_spill]] }
 0x3f6   : > { %s2995_s24 = sld [smem:[#allocation17_spill]] }
 0x3f7   : > { %s2996_s25 = sld [smem:[#allocation18_spill]] }
 0x3f8   : > { %s2997_s27 = sld [smem:[#allocation20_spill]] }
 0x3fb   : > { %s22_s28 = sadd.s32 1, %s2994_s21   ;;  %s2998_s21 = smov %s2346_s22 }
 0x3fc   : > { %p19_p13 = scmp.ge.s32.totalorder %s22_s28, 24   ;;  %s2999_s22 = smov %s2350_s23 }
 0x3fd   : > { %s3000_s23 = smov %s2533_s26  ;;  %s3001_s26 = smov %s3003_s20 }
 0x3fe   :  { %21 = sbr.rel (!%p19_p13) target bundleno = 13 (0xd), region = 116 }
 0x403   :  { %1427 = vsyncpa [#allocation5], 1 }
 0x404   :  { %1429 = vsyncpa [#allocation5 + $0x1], 1 }
 0x405   :  { %1430 = vsyncpa [#allocation8], 1 }
 0x406   :  { %1431 = vsyncpa [#allocation11], 1 }
 0x407   :  { %1432 = vsyncpa [#allocation6], 1 }
 0x408   :  { %1434 = vsyncpa [#allocation6 + $0x1], 1 }

</bundles_post_ra>
